<compile_context>
chip_gen: v6e
topology: v6e:2x2x1
jax: 0.10.0
libtpu: 0.0.40
codegen_flags: <defaults>
</compile_context>

<pallas_src>
import random

import jax
import jax.numpy as jnp
from jax import lax
from jax.experimental import pallas as pl
from jax.experimental.pallas import tpu as pltpu


def _round_up(x, m):
    return ((x + m - 1) // m) * m


# ----------------------------------------------------------------------------
# encoder kernel: hoisted input projection + GRU recurrence + attention keys
# ----------------------------------------------------------------------------
def _encoder_kernel(x_ref, wih_ref, whh_ref, bih_ref, bhh_ref, wa_enc_ref,
                    enc_out_ref, keys_ref, hid_ref, iall_sc):
    S, B, E = x_ref.shape
    H = whh_ref.shape[0]
    G = wih_ref.shape[1]          # fused gate width (3H lane-padded to 128)

    # Hoisted input-to-hidden projection for ALL timesteps: one MXU-friendly
    # (S*B, E) @ (E, G) matmul instead of S tiny per-step matmuls.
    x_all = x_ref[...].reshape(S * B, E)
    i_all = (jnp.dot(x_all, wih_ref[...], preferred_element_type=jnp.float32)
             + bih_ref[...])
    iall_sc[...] = i_all.reshape(S, B, G)

    def step(s, h):
        ia = iall_sc[s]                                        # (B, G)
        ha = (jnp.dot(h, whh_ref[...], preferred_element_type=jnp.float32)
              + bhh_ref[...])                                  # (B, G)
        r = jax.nn.sigmoid(ia[:, 0:H] + ha[:, 0:H])
        z = jax.nn.sigmoid(ia[:, H:2 * H] + ha[:, H:2 * H])
        n = jnp.tanh(ia[:, 2 * H:3 * H] + r * ha[:, 2 * H:3 * H])
        h_new = (1.0 - z) * n + z * h
        enc_out_ref[s] = h_new                                 # leading-axis store
        return h_new

    h_fin = lax.fori_loop(0, S, step, jnp.zeros((B, H), jnp.float32))
    hid_ref[...] = h_fin

    # Attention "key" projection hoisted out of the decode loop (computed once).
    keys_ref[...] = jnp.dot(
        enc_out_ref[...].reshape(S * B, H), wa_enc_ref[...],
        preferred_element_type=jnp.float32).reshape(S, B, H)


def encoder_pallas(x_sbe, params):
    S, B, E = x_sbe.shape
    H = params["enc_whh"].shape[0]
    G = params["enc_whh"].shape[1]
    enc_out, keys, hidden = pl.pallas_call(
        _encoder_kernel,
        out_shape=(
            jax.ShapeDtypeStruct((S, B, H), jnp.float32),   # encoder outputs
            jax.ShapeDtypeStruct((S, B, H), jnp.float32),   # attention keys
            jax.ShapeDtypeStruct((B, H), jnp.float32),      # final hidden
        ),
        scratch_shapes=[pltpu.VMEM((S, B, G), jnp.float32)],
    )(x_sbe, params["enc_wih"], params["enc_whh"],
      params["enc_bih"], params["enc_bhh"], params["att_wa_enc"])
    return enc_out, keys, hidden


# ----------------------------------------------------------------------------
# fused decoder kernel: grid=(T-1,), VMEM-resident state, in-kernel argmax
# ----------------------------------------------------------------------------
def _decoder_kernel(tf_ref,
                    temb_ref, enc_ref, keys_ref, mask_ref, h0_ref,
                    wa_h_ref, va_ref, dec_emb_ref,
                    wih_e_ref, wih_c_ref, whh_ref, bih_ref, bhh_ref,
                    wout_h_ref, wout_c_ref, wout_e_ref, bout_ref,
                    out_ref,
                    hid_sc, pemb_sc):
    t = pl.program_id(0)
    S, B, H = enc_ref.shape
    V = dec_emb_ref.shape[0]      # real vocab size
    Vp = bout_ref.shape[1]        # lane-padded vocab size

    teach = temb_ref[0]                                        # (B, E)

    @pl.when(t == 0)
    def _():
        hid_sc[...] = h0_ref[...]
        pemb_sc[...] = teach

    # input embedding: step 0 always teacher; otherwise teacher-force flag picks
    # between teacher token embedding and previous-step greedy prediction.
    use_teacher = jnp.logical_or(t == 0, tf_ref[t] == 1)
    emb = jnp.where(use_teacher, teach, pemb_sc[...])          # (B, E)
    h = hid_sc[...]                                            # (B, H)

    # ---- additive attention (keys precomputed in the encoder kernel) ----
    q = jnp.dot(h, wa_h_ref[...], preferred_element_type=jnp.float32)   # (B,H)
    energy = jnp.tanh(q[None, :, :] + keys_ref[...])                    # (S,B,H)
    scores = jnp.sum(energy * va_ref[...][None, :, :], axis=-1)         # (S,B)
    scores = jnp.where(mask_ref[...] > 0.5, scores, -1e10)
    m = jnp.max(scores, axis=0, keepdims=True)                          # (1,B)
    p = jnp.exp(scores - m)
    denom = jnp.sum(p, axis=0, keepdims=True)
    attn = p * pl.reciprocal(denom, approx=True)                        # (S,B)
    ctx = jnp.sum(attn[:, :, None] * enc_ref[...], axis=0)              # (B,H)

    # ---- fused GRU cell on [emb ; ctx] without any concatenate ----
    ia = (jnp.dot(emb, wih_e_ref[...], preferred_element_type=jnp.float32)
          + jnp.dot(ctx, wih_c_ref[...], preferred_element_type=jnp.float32)
          + bih_ref[...])                                               # (B,G)
    ha = (jnp.dot(h, whh_ref[...], preferred_element_type=jnp.float32)
          + bhh_ref[...])                                               # (B,G)
    r = jax.nn.sigmoid(ia[:, 0:H] + ha[:, 0:H])
    z = jax.nn.sigmoid(ia[:, H:2 * H] + ha[:, H:2 * H])
    n = jnp.tanh(ia[:, 2 * H:3 * H] + r * ha[:, 2 * H:3 * H])
    h_new = (1.0 - z) * n + z * h
    hid_sc[...] = h_new

    # ---- output projection on [h_new ; ctx ; emb], lane-dense Vp output ----
    logits = (jnp.dot(h_new, wout_h_ref[...], preferred_element_type=jnp.float32)
              + jnp.dot(ctx, wout_c_ref[...], preferred_element_type=jnp.float32)
              + jnp.dot(emb, wout_e_ref[...], preferred_element_type=jnp.float32)
              + bout_ref[...])                                          # (B,Vp)
    out_ref[0] = logits

    # ---- greedy prediction -> next-step input embedding (stays in VMEM) ----
    lane = lax.broadcasted_iota(jnp.int32, (B, Vp), 1)
    masked = jnp.where(lane < V, logits, jnp.float32(-1e30))
    row_max = jnp.max(masked, axis=1, keepdims=True)
    idx = jnp.min(jnp.where(masked == row_max, lane, Vp),
                  axis=1, keepdims=True)                                # (B,1)
    onehot = (lax.broadcasted_iota(jnp.int32, (B, V), 1) == idx
              ).astype(jnp.float32)                                     # (B,V)
    pemb_sc[...] = jnp.dot(onehot, dec_emb_ref[...],
                           preferred_element_type=jnp.float32)          # (B,E)


def decoder_pallas(teacher_emb, tf, enc_out, enc_keys, mask_sb, h0, params):
    Tm1, B, E = teacher_emb.shape
    S, _, H = enc_out.shape
    G = params["dec_whh"].shape[1]
    V = params["dec_emb"].shape[0]
    Vp = params["dec_bout"].shape[1]

    const2 = lambda t, tf_ref: (0, 0)          # noqa: E731  (weights: fetch once)
    const3 = lambda t, tf_ref: (0, 0, 0)       # noqa: E731

    grid_spec = pltpu.PrefetchScalarGridSpec(
        num_scalar_prefetch=1,                  # tf flags -> SMEM
        grid=(Tm1,),
        in_specs=[
            pl.BlockSpec((1, B, E), lambda t, tf_ref: (t, 0, 0)),  # teacher emb
            pl.BlockSpec((S, B, H), const3),                       # enc outputs
            pl.BlockSpec((S, B, H), const3),                       # enc keys
            pl.BlockSpec((S, B), const2),                          # attn mask
            pl.BlockSpec((B, H), const2),                          # h0
            pl.BlockSpec((H, H), const2),                          # att_wa_h
            pl.BlockSpec((1, H), const2),                          # att_va
            pl.BlockSpec((V, E), const2),                          # dec_emb
            pl.BlockSpec((E, G), const2),                          # dec_wih_e
            pl.BlockSpec((H, G), const2),                          # dec_wih_c
            pl.BlockSpec((H, G), const2),                          # dec_whh
            pl.BlockSpec((1, G), const2),                          # dec_bih
            pl.BlockSpec((1, G), const2),                          # dec_bhh
            pl.BlockSpec((H, Vp), const2),                         # dec_wout_h
            pl.BlockSpec((H, Vp), const2),                         # dec_wout_c
            pl.BlockSpec((E, Vp), const2),                         # dec_wout_e
            pl.BlockSpec((1, Vp), const2),                         # dec_bout
        ],
        out_specs=pl.BlockSpec((1, B, Vp), lambda t, tf_ref: (t, 0, 0)),
        scratch_shapes=[pltpu.VMEM((B, H), jnp.float32),   # hidden state
                        pltpu.VMEM((B, E), jnp.float32)],  # prev pred embedding
    )
    return pl.pallas_call(
        _decoder_kernel,
        grid_spec=grid_spec,
        out_shape=jax.ShapeDtypeStruct((Tm1, B, Vp), jnp.float32),
        compiler_params=pltpu.CompilerParams(
            dimension_semantics=("arbitrary",)),      # sequential recurrence
    )(tf, teacher_emb, enc_out, enc_keys, mask_sb, h0,
      params["att_wa_h"], params["att_va"], params["dec_emb"],
      params["dec_wih_e"], params["dec_wih_c"], params["dec_whh"],
      params["dec_bih"], params["dec_bhh"],
      params["dec_wout_h"], params["dec_wout_c"], params["dec_wout_e"],
      params["dec_bout"])


# ----------------------------------------------------------------------------
# Seq2Seq wrapper mirroring the PyTorch forward()
# ----------------------------------------------------------------------------
class Seq2SeqPallas:
    def __init__(self, params, output_dim, pad_id=0):
        self.params = params
        self.output_dim = output_dim
        self.pad_id = pad_id
        self._fwd = jax.jit(self._forward_jax)

    def get_att_mask(self, inputs):
        return (inputs["source_ids"] != self.pad_id).astype(jnp.float32)

    def _forward_jax(self, params, src_ids, qst_ids, tf):
        B, S = src_ids.shape
        T = qst_ids.shape[1]
        V = self.output_dim

        mask_sb = (src_ids != self.pad_id).astype(jnp.float32).T        # (S,B)

        # embedding gathers land directly in time-major layout (only the tiny
        # int id arrays are transposed).
        src_emb = jnp.take(params["enc_emb"], src_ids.T, axis=0)        # (S,B,E)
        teacher_emb = jnp.take(params["dec_emb"],
                               qst_ids[:, :T - 1].T, axis=0)            # (T-1,B,E)

        enc_out, enc_keys, hidden = encoder_pallas(src_emb, params)
        logits_t = decoder_pallas(teacher_emb, tf, enc_out, enc_keys,
                                  mask_sb, hidden, params)              # (T-1,B,Vp)

        logits = jnp.transpose(logits_t, (1, 0, 2))[:, :, :V]           # (B,T-1,V)
        zeros0 = jnp.zeros((B, 1, V), jnp.float32)
        return jnp.concatenate([zeros0, logits], axis=1)                # (B,T,V)

    def forward(self, inputs, teacher_force_ratio=0.5):
        qst_ids = inputs["question_ids"]
        src_ids = inputs["source_ids"]
        T = qst_ids.shape[1]
        # Host-side teacher-forcing draws (same number/order of random.random()
        # calls as the torch loop). tf[t] gates the input of decode step t
        # (t >= 1); step 0 always consumes qst_ids[:, 0].
        tf_flags = [0]
        for word_idx in range(1, T):
            draw = 1 if random.random() < teacher_force_ratio else 0
            if word_idx <= T - 2:
                tf_flags.append(draw)
        tf = jnp.asarray(tf_flags, dtype=jnp.int32)                     # (T-1,)
        return self._fwd(self.params, src_ids, qst_ids, tf)


# ----------------------------------------------------------------------------
# deterministic parameter construction + demo
# ----------------------------------------------------------------------------
def init_params(key, *, src_vocab, out_vocab, emb_dim, hidden):
    E, H, V = emb_dim, hidden, out_vocab
    G3 = 3 * H
    G = _round_up(G3, 128)      # fused gate width, lane-padded
    Vp = _round_up(V, 128)      # lane-padded vocab

    keys = jax.random.split(key, 18)
    s = 0.1

    def rnd(k, shape):
        return s * jax.random.normal(k, shape, jnp.float32)

    def pad_last(a, n):
        return jnp.pad(a, [(0, 0)] * (a.ndim - 1) + [(0, n - a.shape[-1])])

    return {
        # embeddings
        "enc_emb": rnd(keys[0], (src_vocab, E)),
        "dec_emb": rnd(keys[1], (V, E)),
        # encoder GRU, gates fused along lanes as [r | z | n], padded to G
        "enc_wih": pad_last(rnd(keys[2], (E, G3)), G),
        "enc_whh": pad_last(rnd(keys[3], (H, G3)), G),
        "enc_bih": pad_last(rnd(keys[4], (1, G3)), G),
        "enc_bhh": pad_last(rnd(keys[5], (1, G3)), G),
        # additive attention, split into h / enc halves (no runtime concat)
        "att_wa_h": rnd(keys[6], (H, H)),
        "att_wa_enc": rnd(keys[7], (H, H)),
        "att_va": rnd(keys[8], (1, H)),
        # decoder GRU (input = [emb ; ctx], weights split accordingly)
        "dec_wih_e": pad_last(rnd(keys[9], (E, G3)), G),
        "dec_wih_c": pad_last(rnd(keys[10], (H, G3)), G),
        "dec_whh": pad_last(rnd(keys[11], (H, G3)), G),
        "dec_bih": pad_last(rnd(keys[12], (1, G3)), G),
        "dec_bhh": pad_last(rnd(keys[13], (1, G3)), G),
        # output projection on [h_new ; ctx ; emb], vocab lane-padded
        "dec_wout_h": pad_last(rnd(keys[14], (H, V)), Vp),
        "dec_wout_c": pad_last(rnd(keys[15], (H, V)), Vp),
        "dec_wout_e": pad_last(rnd(keys[16], (E, V)), Vp),
        "dec_bout": pad_last(rnd(keys[17], (1, V)), Vp),
    }


if __name__ == "__main__":
    random.seed(0)   # deterministic teacher forcing
    key = jax.random.PRNGKey(0)

    B, S, T = 2, 8, 8          # batch, source len, target len
    E, H = 32, 32              # embedding / hidden dims
    SRC_VOCAB, OUT_VOCAB = 32, 32

    kp, k1, k2 = jax.random.split(key, 3)
    params = init_params(kp, src_vocab=SRC_VOCAB, out_vocab=OUT_VOCAB,
                         emb_dim=E, hidden=H)

    source_ids = jax.random.randint(k1, (B, S), 1, SRC_VOCAB, dtype=jnp.int32)
    # sprinkle some padding (id 0) so the attention mask actually masks
    source_ids = source_ids.at[:, -2:].set(0)
    question_ids = jax.random.randint(k2, (B, T), 1, OUT_VOCAB, dtype=jnp.int32)

    model = Seq2SeqPallas(params, output_dim=OUT_VOCAB, pad_id=0)
    outputs = model.forward(
        {"source_ids": source_ids, "question_ids": question_ids},
        teacher_force_ratio=0.5,
    )
    outputs = jax.block_until_ready(outputs)

    assert outputs.shape == (B, T, OUT_VOCAB)
    assert bool(jnp.all(jnp.isfinite(outputs)))
    # position 0 is never written (matches the PyTorch loop starting at 1)
    assert bool(jnp.all(outputs[:, 0] == 0.0))
    print("KERNEL_OK")
</pallas_src>

<mosaic_0001>
module attributes {stable_mosaic.version = 11 : i64} {
  func.func @_encoder_kernel(%arg0: memref<8x2x32xf32, #tpu.memory_space<vmem>>, %arg1: memref<32x128xf32, #tpu.memory_space<vmem>>, %arg2: memref<32x128xf32, #tpu.memory_space<vmem>>, %arg3: memref<1x128xf32, #tpu.memory_space<vmem>>, %arg4: memref<1x128xf32, #tpu.memory_space<vmem>>, %arg5: memref<32x32xf32, #tpu.memory_space<vmem>>, %arg6: memref<8x2x32xf32, #tpu.memory_space<vmem>>, %arg7: memref<8x2x32xf32, #tpu.memory_space<vmem>>, %arg8: memref<2x32xf32, #tpu.memory_space<vmem>>, %arg9: memref<8x2x128xf32, #tpu.memory_space<vmem>>) attributes {dimension_semantics = [], scalar_prefetch = 0 : i64, scratch_operands = 1 : i64, tpu.core_type = #tpu.core_type<tc>} {
    %c0 = arith.constant 0 : index
    %c0_0 = arith.constant 0 : index
    %c0_1 = arith.constant 0 : index
    %0 = vector.load %arg0[%c0, %c0_0, %c0_1] : memref<8x2x32xf32, #tpu.memory_space<vmem>>, vector<8x2x32xf32>
    %1 = vector.shape_cast %0 : vector<8x2x32xf32> to vector<16x32xf32>
    %c0_2 = arith.constant 0 : index
    %c0_3 = arith.constant 0 : index
    %2 = vector.load %arg1[%c0_2, %c0_3] : memref<32x128xf32, #tpu.memory_space<vmem>>, vector<32x128xf32>
    %cst = arith.constant dense<0.000000e+00> : vector<16x128xf32>
    %3 = tpu.matmul %1, %2, %cst {dimension_numbers = #tpu.dot_dimension_numbers<[1], [0], [0], [1], [0, 0, 1, 1], [], []>} : vector<16x32xf32>, vector<32x128xf32>, vector<16x128xf32> -> vector<16x128xf32>
    %c0_4 = arith.constant 0 : index
    %c0_5 = arith.constant 0 : index
    %4 = vector.load %arg3[%c0_4, %c0_5] : memref<1x128xf32, #tpu.memory_space<vmem>>, vector<1x128xf32>
    %5 = vector.broadcast %4 : vector<1x128xf32> to vector<16x128xf32>
    %6 = arith.addf %3, %5 : vector<16x128xf32>
    %7 = vector.shape_cast %6 : vector<16x128xf32> to vector<8x2x128xf32>
    %c0_6 = arith.constant 0 : index
    %c0_7 = arith.constant 0 : index
    %c0_8 = arith.constant 0 : index
    %8 = vector.load %arg9[%c0_6, %c0_7, %c0_8] : memref<8x2x128xf32, #tpu.memory_space<vmem>>, vector<8x2x128xf32>
    tpu.vector_store %arg9[%c0_6, %c0_7, %c0_8], %7 {strides = array<i32>} : memref<8x2x128xf32, #tpu.memory_space<vmem>>, vector<8x2x128xf32>,
    %cst_9 = arith.constant 0.000000e+00 : f32
    %9 = vector.broadcast %cst_9 : f32 to vector<2x32xf32>
    %c0_i32 = arith.constant 0 : i32
    %c8_i32 = arith.constant 8 : i32
    %10 = arith.addi %c0_i32, %c8_i32 : i32
    %c1_i32 = arith.constant 1 : i32
    %11 = scf.for %arg10 = %c0_i32 to %10 step %c1_i32 iter_args(%arg11 = %9) -> (vector<2x32xf32>)  : i32 {
      %19 = arith.index_cast %arg10 : i32 to index
      %c0_22 = arith.constant 0 : index
      %c0_23 = arith.constant 0 : index
      %20 = vector.load %arg9[%19, %c0_22, %c0_23] : memref<8x2x128xf32, #tpu.memory_space<vmem>>, vector<1x2x128xf32>
      %21 = vector.shape_cast %20 : vector<1x2x128xf32> to vector<2x128xf32>
      %c0_24 = arith.constant 0 : index
      %c0_25 = arith.constant 0 : index
      %22 = vector.load %arg2[%c0_24, %c0_25] : memref<32x128xf32, #tpu.memory_space<vmem>>, vector<32x128xf32>
      %cst_26 = arith.constant dense<0.000000e+00> : vector<2x128xf32>
      %23 = tpu.matmul %arg11, %22, %cst_26 {dimension_numbers = #tpu.dot_dimension_numbers<[1], [0], [0], [1], [0, 0, 1, 1], [], []>} : vector<2x32xf32>, vector<32x128xf32>, vector<2x128xf32> -> vector<2x128xf32>
      %c0_27 = arith.constant 0 : index
      %c0_28 = arith.constant 0 : index
      %24 = vector.load %arg4[%c0_27, %c0_28] : memref<1x128xf32, #tpu.memory_space<vmem>>, vector<1x128xf32>
      %25 = vector.broadcast %24 : vector<1x128xf32> to vector<2x128xf32>
      %26 = arith.addf %23, %25 : vector<2x128xf32>
      %27 = vector.extract_strided_slice %21 {offsets = [0, 0], sizes = [2, 32], strides = [1, 1]} : vector<2x128xf32> to vector<2x32xf32>
      %28 = vector.extract_strided_slice %26 {offsets = [0, 0], sizes = [2, 32], strides = [1, 1]} : vector<2x128xf32> to vector<2x32xf32>
      %29 = arith.addf %27, %28 : vector<2x32xf32>
      %30 = arith.negf %29 : vector<2x32xf32>
      %31 = math.exp %30 : vector<2x32xf32>
      %cst_29 = arith.constant 1.000000e+00 : f32
      %32 = vector.broadcast %cst_29 : f32 to vector<2x32xf32>
      %33 = arith.addf %32, %31 : vector<2x32xf32>
      %34 = arith.divf %32, %33 : vector<2x32xf32>
      %35 = vector.extract_strided_slice %21 {offsets = [0, 32], sizes = [2, 32], strides = [1, 1]} : vector<2x128xf32> to vector<2x32xf32>
      %36 = vector.extract_strided_slice %26 {offsets = [0, 32], sizes = [2, 32], strides = [1, 1]} : vector<2x128xf32> to vector<2x32xf32>
      %37 = arith.addf %35, %36 : vector<2x32xf32>
      %38 = arith.negf %37 : vector<2x32xf32>
      %39 = math.exp %38 : vector<2x32xf32>
      %cst_30 = arith.constant 1.000000e+00 : f32
      %40 = vector.broadcast %cst_30 : f32 to vector<2x32xf32>
      %41 = arith.addf %40, %39 : vector<2x32xf32>
      %42 = arith.divf %40, %41 : vector<2x32xf32>
      %43 = vector.extract_strided_slice %21 {offsets = [0, 64], sizes = [2, 32], strides = [1, 1]} : vector<2x128xf32> to vector<2x32xf32>
      %44 = vector.extract_strided_slice %26 {offsets = [0, 64], sizes = [2, 32], strides = [1, 1]} : vector<2x128xf32> to vector<2x32xf32>
      %45 = arith.mulf %34, %44 : vector<2x32xf32>
      %46 = arith.addf %43, %45 : vector<2x32xf32>
      %47 = math.tanh %46 : vector<2x32xf32>
      %cst_31 = arith.constant 1.000000e+00 : f32
      %48 = vector.broadcast %cst_31 : f32 to vector<2x32xf32>
      %49 = arith.subf %48, %42 : vector<2x32xf32>
      %50 = arith.mulf %49, %47 : vector<2x32xf32>
      %51 = arith.mulf %42, %arg11 : vector<2x32xf32>
      %52 = arith.addf %50, %51 : vector<2x32xf32>
      %53 = arith.index_cast %arg10 : i32 to index
      %c0_32 = arith.constant 0 : index
      %c0_33 = arith.constant 0 : index
      %54 = vector.load %arg6[%53, %c0_32, %c0_33] : memref<8x2x32xf32, #tpu.memory_space<vmem>>, vector<1x2x32xf32>
      %55 = vector.shape_cast %54 : vector<1x2x32xf32> to vector<2x32xf32>
      %56 = vector.shape_cast %52 : vector<2x32xf32> to vector<1x2x32xf32>
      tpu.vector_store %arg6[%53, %c0_32, %c0_33], %56 {strides = array<i32>} : memref<8x2x32xf32, #tpu.memory_space<vmem>>, vector<1x2x32xf32>,
      scf.yield %52 : vector<2x32xf32>
    }
    %c8_i32_10 = arith.constant 8 : i32
    %c0_11 = arith.constant 0 : index
    %c0_12 = arith.constant 0 : index
    %12 = vector.load %arg8[%c0_11, %c0_12] : memref<2x32xf32, #tpu.memory_space<vmem>>, vector<2x32xf32>
    tpu.vector_store %arg8[%c0_11, %c0_12], %11 {strides = array<i32>} : memref<2x32xf32, #tpu.memory_space<vmem>>, vector<2x32xf32>,
    %c0_13 = arith.constant 0 : index
    %c0_14 = arith.constant 0 : index
    %c0_15 = arith.constant 0 : index
    %13 = vector.load %arg6[%c0_13, %c0_14, %c0_15] : memref<8x2x32xf32, #tpu.memory_space<vmem>>, vector<8x2x32xf32>
    %14 = vector.shape_cast %13 : vector<8x2x32xf32> to vector<16x32xf32>
    %c0_16 = arith.constant 0 : index
    %c0_17 = arith.constant 0 : index
    %15 = vector.load %arg5[%c0_16, %c0_17] : memref<32x32xf32, #tpu.memory_space<vmem>>, vector<32x32xf32>
    %cst_18 = arith.constant dense<0.000000e+00> : vector<16x32xf32>
    %16 = tpu.matmul %14, %15, %cst_18 {dimension_numbers = #tpu.dot_dimension_numbers<[1], [0], [0], [1], [0, 0, 1, 1], [], []>} : vector<16x32xf32>, vector<32x32xf32>, vector<16x32xf32> -> vector<16x32xf32>
    %17 = vector.shape_cast %16 : vector<16x32xf32> to vector<8x2x32xf32>
    %c0_19 = arith.constant 0 : index
    %c0_20 = arith.constant 0 : index
    %c0_21 = arith.constant 0 : index
    %18 = vector.load %arg7[%c0_19, %c0_20, %c0_21] : memref<8x2x32xf32, #tpu.memory_space<vmem>>, vector<8x2x32xf32>
    tpu.vector_store %arg7[%c0_19, %c0_20, %c0_21], %17 {strides = array<i32>} : memref<8x2x32xf32, #tpu.memory_space<vmem>>, vector<8x2x32xf32>,
    return
  }
}

module attributes {stable_mosaic.version = 11 : i64} {
  func.func @_decoder_kernel(%arg0: i32, %arg1: memref<7xi32, #tpu.memory_space<smem>>, %arg2: memref<1x2x32xf32, #tpu.memory_space<vmem>>, %arg3: memref<8x2x32xf32, #tpu.memory_space<vmem>>, %arg4: memref<8x2x32xf32, #tpu.memory_space<vmem>>, %arg5: memref<8x2xf32, #tpu.memory_space<vmem>>, %arg6: memref<2x32xf32, #tpu.memory_space<vmem>>, %arg7: memref<32x32xf32, #tpu.memory_space<vmem>>, %arg8: memref<1x32xf32, #tpu.memory_space<vmem>>, %arg9: memref<32x32xf32, #tpu.memory_space<vmem>>, %arg10: memref<32x128xf32, #tpu.memory_space<vmem>>, %arg11: memref<32x128xf32, #tpu.memory_space<vmem>>, %arg12: memref<32x128xf32, #tpu.memory_space<vmem>>, %arg13: memref<1x128xf32, #tpu.memory_space<vmem>>, %arg14: memref<1x128xf32, #tpu.memory_space<vmem>>, %arg15: memref<32x128xf32, #tpu.memory_space<vmem>>, %arg16: memref<32x128xf32, #tpu.memory_space<vmem>>, %arg17: memref<32x128xf32, #tpu.memory_space<vmem>>, %arg18: memref<1x128xf32, #tpu.memory_space<vmem>>, %arg19: memref<1x2x128xf32, #tpu.memory_space<vmem>>, %arg20: memref<2x32xf32, #tpu.memory_space<vmem>>, %arg21: memref<2x32xf32, #tpu.memory_space<vmem>>) attributes {dimension_semantics = [#tpu.dimension_semantics<arbitrary>], iteration_bounds = array<i64: 7>, scalar_prefetch = 1 : i64, scratch_operands = 2 : i64, tpu.core_type = #tpu.core_type<tc>, window_params = [{transform_indices = @transform_0, window_bounds = array<i64: 1, 2, 32>}, {pipeline_mode = #tpu.pipeline_mode<synchronous>, transform_indices = @transform_1, window_bounds = array<i64: 8, 2, 32>}, {pipeline_mode = #tpu.pipeline_mode<synchronous>, transform_indices = @transform_2, window_bounds = array<i64: 8, 2, 32>}, {pipeline_mode = #tpu.pipeline_mode<synchronous>, transform_indices = @transform_3, window_bounds = array<i64: 8, 2>}, {pipeline_mode = #tpu.pipeline_mode<synchronous>, transform_indices = @transform_4, window_bounds = array<i64: 2, 32>}, {pipeline_mode = #tpu.pipeline_mode<synchronous>, transform_indices = @transform_5, window_bounds = array<i64: 32, 32>}, {pipeline_mode = #tpu.pipeline_mode<synchronous>, transform_indices = @transform_6, window_bounds = array<i64: 1, 32>}, {pipeline_mode = #tpu.pipeline_mode<synchronous>, transform_indices = @transform_7, window_bounds = array<i64: 32, 32>}, {pipeline_mode = #tpu.pipeline_mode<synchronous>, transform_indices = @transform_8, window_bounds = array<i64: 32, 128>}, {pipeline_mode = #tpu.pipeline_mode<synchronous>, transform_indices = @transform_9, window_bounds = array<i64: 32, 128>}, {pipeline_mode = #tpu.pipeline_mode<synchronous>, transform_indices = @transform_10, window_bounds = array<i64: 32, 128>}, {pipeline_mode = #tpu.pipeline_mode<synchronous>, transform_indices = @transform_11, window_bounds = array<i64: 1, 128>}, {pipeline_mode = #tpu.pipeline_mode<synchronous>, transform_indices = @transform_12, window_bounds = array<i64: 1, 128>}, {pipeline_mode = #tpu.pipeline_mode<synchronous>, transform_indices = @transform_13, window_bounds = array<i64: 32, 128>}, {pipeline_mode = #tpu.pipeline_mode<synchronous>, transform_indices = @transform_14, window_bounds = array<i64: 32, 128>}, {pipeline_mode = #tpu.pipeline_mode<synchronous>, transform_indices = @transform_15, window_bounds = array<i64: 32, 128>}, {pipeline_mode = #tpu.pipeline_mode<synchronous>, transform_indices = @transform_16, window_bounds = array<i64: 1, 128>}, {transform_indices = @transform_17, window_bounds = array<i64: 1, 2, 128>}]} {
    %c0 = arith.constant 0 : index
    %c0_0 = arith.constant 0 : index
    %c0_1 = arith.constant 0 : index
    %0 = vector.load %arg2[%c0, %c0_0, %c0_1] : memref<1x2x32xf32, #tpu.memory_space<vmem>>, vector<1x2x32xf32>
    %1 = vector.shape_cast %0 : vector<1x2x32xf32> to vector<2x32xf32>
    %c0_i32 = arith.constant 0 : i32
    %2 = arith.cmpi eq, %arg0, %c0_i32 : i32
    %3 = arith.extui %2 : i1 to i32
    %c0_i32_2 = arith.constant 0 : i32
    %4 = arith.cmpi ne, %3, %c0_i32_2 : i32
    scf.if %4 {
      %c0_66 = arith.constant 0 : index
      %c0_67 = arith.constant 0 : index
      %120 = vector.load %arg6[%c0_66, %c0_67] : memref<2x32xf32, #tpu.memory_space<vmem>>, vector<2x32xf32>
      %c0_68 = arith.constant 0 : index
      %c0_69 = arith.constant 0 : index
      %121 = vector.load %arg20[%c0_68, %c0_69] : memref<2x32xf32, #tpu.memory_space<vmem>>, vector<2x32xf32>
      tpu.vector_store %arg20[%c0_68, %c0_69], %120 {strides = array<i32>} : memref<2x32xf32, #tpu.memory_space<vmem>>, vector<2x32xf32>,
      %c0_70 = arith.constant 0 : index
      %c0_71 = arith.constant 0 : index
      %122 = vector.load %arg21[%c0_70, %c0_71] : memref<2x32xf32, #tpu.memory_space<vmem>>, vector<2x32xf32>
      tpu.vector_store %arg21[%c0_70, %c0_71], %1 {strides = array<i32>} : memref<2x32xf32, #tpu.memory_space<vmem>>, vector<2x32xf32>,
    } else {
    }
    %c0_i32_3 = arith.constant 0 : i32
    %5 = arith.cmpi eq, %arg0, %c0_i32_3 : i32
    %6 = arith.index_cast %arg0 : i32 to index
    %7 = memref.load %arg1[%6] : memref<7xi32, #tpu.memory_space<smem>>
    %c1_i32 = arith.constant 1 : i32
    %8 = arith.cmpi eq, %7, %c1_i32 : i32
    %9 = arith.ori %5, %8 : i1
    %c0_4 = arith.constant 0 : index
    %c0_5 = arith.constant 0 : index
    %10 = vector.load %arg21[%c0_4, %c0_5] : memref<2x32xf32, #tpu.memory_space<vmem>>, vector<2x32xf32>
    %11 = arith.select %9, %1, %10 : vector<2x32xf32>
    %c0_6 = arith.constant 0 : index
    %c0_7 = arith.constant 0 : index
    %12 = vector.load %arg20[%c0_6, %c0_7] : memref<2x32xf32, #tpu.memory_space<vmem>>, vector<2x32xf32>
    %c0_8 = arith.constant 0 : index
    %c0_9 = arith.constant 0 : index
    %13 = vector.load %arg7[%c0_8, %c0_9] : memref<32x32xf32, #tpu.memory_space<vmem>>, vector<32x32xf32>
    %cst = arith.constant dense<0.000000e+00> : vector<2x32xf32>
    %14 = tpu.matmul %12, %13, %cst {dimension_numbers = #tpu.dot_dimension_numbers<[1], [0], [0], [1], [0, 0, 1, 1], [], []>} : vector<2x32xf32>, vector<32x32xf32>, vector<2x32xf32> -> vector<2x32xf32>
    %15 = vector.shape_cast %14 : vector<2x32xf32> to vector<1x2x32xf32>
    %c0_10 = arith.constant 0 : index
    %c0_11 = arith.constant 0 : index
    %c0_12 = arith.constant 0 : index
    %16 = vector.load %arg4[%c0_10, %c0_11, %c0_12] : memref<8x2x32xf32, #tpu.memory_space<vmem>>, vector<8x2x32xf32>
    %17 = vector.broadcast %15 : vector<1x2x32xf32> to vector<8x2x32xf32>
    %18 = arith.addf %17, %16 : vector<8x2x32xf32>
    %19 = math.tanh %18 : vector<8x2x32xf32>
    %c0_13 = arith.constant 0 : index
    %c0_14 = arith.constant 0 : index
    %20 = vector.load %arg8[%c0_13, %c0_14] : memref<1x32xf32, #tpu.memory_space<vmem>>, vector<1x32xf32>
    %21 = vector.shape_cast %20 : vector<1x32xf32> to vector<1x1x32xf32>
    %22 = vector.broadcast %21 : vector<1x1x32xf32> to vector<8x2x32xf32>
    %23 = arith.mulf %19, %22 : vector<8x2x32xf32>
    %cst_15 = arith.constant dense<0.000000e+00> : vector<8x2xf32>
    %24 = vector.multi_reduction <add>, %23, %cst_15 [2] : vector<8x2x32xf32> to vector<8x2xf32>
    %c0_16 = arith.constant 0 : index
    %c0_17 = arith.constant 0 : index
    %25 = vector.load %arg5[%c0_16, %c0_17] : memref<8x2xf32, #tpu.memory_space<vmem>>, vector<8x2xf32>
    %cst_18 = arith.constant 5.000000e-01 : f32
    %26 = vector.broadcast %cst_18 : f32 to vector<8x2xf32>
    %27 = arith.cmpf ogt, %25, %26 : vector<8x2xf32>
    %cst_19 = arith.constant -1.000000e+10 : f32
    %28 = vector.broadcast %cst_19 : f32 to vector<8x2xf32>
    %29 = arith.select %27, %24, %28 : vector<8x2xi1>, vector<8x2xf32>
    %cst_20 = arith.constant dense<0xFF800000> : vector<2xf32>
    %30 = vector.multi_reduction <maximumf>, %29, %cst_20 [0] : vector<8x2xf32> to vector<2xf32>
    %31 = vector.shape_cast %30 : vector<2xf32> to vector<1x2xf32>
    %32 = vector.broadcast %31 : vector<1x2xf32> to vector<8x2xf32>
    %33 = arith.subf %29, %32 : vector<8x2xf32>
    %34 = math.exp %33 : vector<8x2xf32>
    %cst_21 = arith.constant dense<0.000000e+00> : vector<2xf32>
    %35 = vector.multi_reduction <add>, %34, %cst_21 [0] : vector<8x2xf32> to vector<2xf32>
    %36 = vector.shape_cast %35 : vector<2xf32> to vector<1x2xf32>
    %37 = tpu.reciprocal %36 {approx = true} : vector<1x2xf32> -> vector<1x2xf32>
    %38 = vector.broadcast %37 : vector<1x2xf32> to vector<8x2xf32>
    %39 = arith.mulf %34, %38 : vector<8x2xf32>
    %40 = vector.shape_cast %39 : vector<8x2xf32> to vector<8x2x1xf32>
    %c0_22 = arith.constant 0 : index
    %c0_23 = arith.constant 0 : index
    %c0_24 = arith.constant 0 : index
    %41 = vector.load %arg3[%c0_22, %c0_23, %c0_24] : memref<8x2x32xf32, #tpu.memory_space<vmem>>, vector<8x2x32xf32>
    %42 = vector.broadcast %40 : vector<8x2x1xf32> to vector<8x2x32xf32>
    %43 = arith.mulf %42, %41 : vector<8x2x32xf32>
    %cst_25 = arith.constant dense<0.000000e+00> : vector<2x32xf32>
    %44 = vector.multi_reduction <add>, %43, %cst_25 [0] : vector<8x2x32xf32> to vector<2x32xf32>
    %c0_26 = arith.constant 0 : index
    %c0_27 = arith.constant 0 : index
    %45 = vector.load %arg10[%c0_26, %c0_27] : memref<32x128xf32, #tpu.memory_space<vmem>>, vector<32x128xf32>
    %cst_28 = arith.constant dense<0.000000e+00> : vector<2x128xf32>
    %46 = tpu.matmul %11, %45, %cst_28 {dimension_numbers = #tpu.dot_dimension_numbers<[1], [0], [0], [1], [0, 0, 1, 1], [], []>} : vector<2x32xf32>, vector<32x128xf32>, vector<2x128xf32> -> vector<2x128xf32>
    %c0_29 = arith.constant 0 : index
    %c0_30 = arith.constant 0 : index
    %47 = vector.load %arg11[%c0_29, %c0_30] : memref<32x128xf32, #tpu.memory_space<vmem>>, vector<32x128xf32>
    %cst_31 = arith.constant dense<0.000000e+00> : vector<2x128xf32>
    %48 = tpu.matmul %44, %47, %cst_31 {dimension_numbers = #tpu.dot_dimension_numbers<[1], [0], [0], [1], [0, 0, 1, 1], [], []>} : vector<2x32xf32>, vector<32x128xf32>, vector<2x128xf32> -> vector<2x128xf32>
    %49 = arith.addf %46, %48 : vector<2x128xf32>
    %c0_32 = arith.constant 0 : index
    %c0_33 = arith.constant 0 : index
    %50 = vector.load %arg13[%c0_32, %c0_33] : memref<1x128xf32, #tpu.memory_space<vmem>>, vector<1x128xf32>
    %51 = vector.broadcast %50 : vector<1x128xf32> to vector<2x128xf32>
    %52 = arith.addf %49, %51 : vector<2x128xf32>
    %c0_34 = arith.constant 0 : index
    %c0_35 = arith.constant 0 : index
    %53 = vector.load %arg12[%c0_34, %c0_35] : memref<32x128xf32, #tpu.memory_space<vmem>>, vector<32x128xf32>
    %cst_36 = arith.constant dense<0.000000e+00> : vector<2x128xf32>
    %54 = tpu.matmul %12, %53, %cst_36 {dimension_numbers = #tpu.dot_dimension_numbers<[1], [0], [0], [1], [0, 0, 1, 1], [], []>} : vector<2x32xf32>, vector<32x128xf32>, vector<2x128xf32> -> vector<2x128xf32>
    %c0_37 = arith.constant 0 : index
    %c0_38 = arith.constant 0 : index
    %55 = vector.load %arg14[%c0_37, %c0_38] : memref<1x128xf32, #tpu.memory_space<vmem>>, vector<1x128xf32>
    %56 = vector.broadcast %55 : vector<1x128xf32> to vector<2x128xf32>
    %57 = arith.addf %54, %56 : vector<2x128xf32>
    %58 = vector.extract_strided_slice %52 {offsets = [0, 0], sizes = [2, 32], strides = [1, 1]} : vector<2x128xf32> to vector<2x32xf32>
    %59 = vector.extract_strided_slice %57 {offsets = [0, 0], sizes = [2, 32], strides = [1, 1]} : vector<2x128xf32> to vector<2x32xf32>
    %60 = arith.addf %58, %59 : vector<2x32xf32>
    %61 = arith.negf %60 : vector<2x32xf32>
    %62 = math.exp %61 : vector<2x32xf32>
    %cst_39 = arith.constant 1.000000e+00 : f32
    %63 = vector.broadcast %cst_39 : f32 to vector<2x32xf32>
    %64 = arith.addf %63, %62 : vector<2x32xf32>
    %65 = arith.divf %63, %64 : vector<2x32xf32>
    %66 = vector.extract_strided_slice %52 {offsets = [0, 32], sizes = [2, 32], strides = [1, 1]} : vector<2x128xf32> to vector<2x32xf32>
    %67 = vector.extract_strided_slice %57 {offsets = [0, 32], sizes = [2, 32], strides = [1, 1]} : vector<2x128xf32> to vector<2x32xf32>
    %68 = arith.addf %66, %67 : vector<2x32xf32>
    %69 = arith.negf %68 : vector<2x32xf32>
    %70 = math.exp %69 : vector<2x32xf32>
    %cst_40 = arith.constant 1.000000e+00 : f32
    %71 = vector.broadcast %cst_40 : f32 to vector<2x32xf32>
    %72 = arith.addf %71, %70 : vector<2x32xf32>
    %73 = arith.divf %71, %72 : vector<2x32xf32>
    %74 = vector.extract_strided_slice %52 {offsets = [0, 64], sizes = [2, 32], strides = [1, 1]} : vector<2x128xf32> to vector<2x32xf32>
    %75 = vector.extract_strided_slice %57 {offsets = [0, 64], sizes = [2, 32], strides = [1, 1]} : vector<2x128xf32> to vector<2x32xf32>
    %76 = arith.mulf %65, %75 : vector<2x32xf32>
    %77 = arith.addf %74, %76 : vector<2x32xf32>
    %78 = math.tanh %77 : vector<2x32xf32>
    %cst_41 = arith.constant 1.000000e+00 : f32
    %79 = vector.broadcast %cst_41 : f32 to vector<2x32xf32>
    %80 = arith.subf %79, %73 : vector<2x32xf32>
    %81 = arith.mulf %80, %78 : vector<2x32xf32>
    %82 = arith.mulf %73, %12 : vector<2x32xf32>
    %83 = arith.addf %81, %82 : vector<2x32xf32>
    %c0_42 = arith.constant 0 : index
    %c0_43 = arith.constant 0 : index
    %84 = vector.load %arg20[%c0_42, %c0_43] : memref<2x32xf32, #tpu.memory_space<vmem>>, vector<2x32xf32>
    tpu.vector_store %arg20[%c0_42, %c0_43], %83 {strides = array<i32>} : memref<2x32xf32, #tpu.memory_space<vmem>>, vector<2x32xf32>,
    %c0_44 = arith.constant 0 : index
    %c0_45 = arith.constant 0 : index
    %85 = vector.load %arg15[%c0_44, %c0_45] : memref<32x128xf32, #tpu.memory_space<vmem>>, vector<32x128xf32>
    %cst_46 = arith.constant dense<0.000000e+00> : vector<2x128xf32>
    %86 = tpu.matmul %83, %85, %cst_46 {dimension_numbers = #tpu.dot_dimension_numbers<[1], [0], [0], [1], [0, 0, 1, 1], [], []>} : vector<2x32xf32>, vector<32x128xf32>, vector<2x128xf32> -> vector<2x128xf32>
    %c0_47 = arith.constant 0 : index
    %c0_48 = arith.constant 0 : index
    %87 = vector.load %arg16[%c0_47, %c0_48] : memref<32x128xf32, #tpu.memory_space<vmem>>, vector<32x128xf32>
    %cst_49 = arith.constant dense<0.000000e+00> : vector<2x128xf32>
    %88 = tpu.matmul %44, %87, %cst_49 {dimension_numbers = #tpu.dot_dimension_numbers<[1], [0], [0], [1], [0, 0, 1, 1], [], []>} : vector<2x32xf32>, vector<32x128xf32>, vector<2x128xf32> -> vector<2x128xf32>
    %89 = arith.addf %86, %88 : vector<2x128xf32>
    %c0_50 = arith.constant 0 : index
    %c0_51 = arith.constant 0 : index
    %90 = vector.load %arg17[%c0_50, %c0_51] : memref<32x128xf32, #tpu.memory_space<vmem>>, vector<32x128xf32>
    %cst_52 = arith.constant dense<0.000000e+00> : vector<2x128xf32>
    %91 = tpu.matmul %11, %90, %cst_52 {dimension_numbers = #tpu.dot_dimension_numbers<[1], [0], [0], [1], [0, 0, 1, 1], [], []>} : vector<2x32xf32>, vector<32x128xf32>, vector<2x128xf32> -> vector<2x128xf32>
    %92 = arith.addf %89, %91 : vector<2x128xf32>
    %c0_53 = arith.constant 0 : index
    %c0_54 = arith.constant 0 : index
    %93 = vector.load %arg18[%c0_53, %c0_54] : memref<1x128xf32, #tpu.memory_space<vmem>>, vector<1x128xf32>
    %94 = vector.broadcast %93 : vector<1x128xf32> to vector<2x128xf32>
    %95 = arith.addf %92, %94 : vector<2x128xf32>
    %c0_55 = arith.constant 0 : index
    %c0_56 = arith.constant 0 : index
    %c0_57 = arith.constant 0 : index
    %96 = vector.load %arg19[%c0_55, %c0_56, %c0_57] : memref<1x2x128xf32, #tpu.memory_space<vmem>>, vector<1x2x128xf32>
    %97 = vector.shape_cast %96 : vector<1x2x128xf32> to vector<2x128xf32>
    %98 = vector.shape_cast %95 : vector<2x128xf32> to vector<1x2x128xf32>
    tpu.vector_store %arg19[%c0_55, %c0_56, %c0_57], %98 {strides = array<i32>} : memref<1x2x128xf32, #tpu.memory_space<vmem>>, vector<1x2x128xf32>,
    %99 = tpu.iota {dimensions = array<i32: 1>} : vector<2x128xi32>
    %c32_i32 = arith.constant 32 : i32
    %100 = vector.broadcast %c32_i32 : i32 to vector<2x128xi32>
    %101 = arith.cmpi slt, %99, %100 : vector<2x128xi32>
    %cst_58 = arith.constant -1.000000e+30 : f32
    %102 = vector.broadcast %cst_58 : f32 to vector<2x128xf32>
    %103 = arith.select %101, %95, %102 : vector<2x128xi1>, vector<2x128xf32>
    %cst_59 = arith.constant dense<0xFF800000> : vector<2xf32>
    %104 = vector.multi_reduction <maximumf>, %103, %cst_59 [1] : vector<2x128xf32> to vector<2xf32>
    %105 = vector.shape_cast %104 : vector<2xf32> to vector<2x1xf32>
    %106 = vector.broadcast %105 : vector<2x1xf32> to vector<2x128xf32>
    %107 = arith.cmpf oeq, %103, %106 : vector<2x128xf32>
    %c128_i32 = arith.constant 128 : i32
    %108 = vector.broadcast %c128_i32 : i32 to vector<2x128xi32>
    %109 = arith.select %107, %99, %108 : vector<2x128xi1>, vector<2x128xi32>
    %cst_60 = arith.constant dense<2147483647> : vector<2xi32>
    %110 = vector.multi_reduction <minsi>, %109, %cst_60 [1] : vector<2x128xi32> to vector<2xi32>
    %111 = vector.shape_cast %110 : vector<2xi32> to vector<2x1xi32>
    %112 = tpu.iota {dimensions = array<i32: 1>} : vector<2x32xi32>
    %113 = vector.broadcast %111 : vector<2x1xi32> to vector<2x32xi32>
    %114 = arith.cmpi eq, %112, %113 : vector<2x32xi32>
    %115 = arith.extui %114 : vector<2x32xi1> to vector<2x32xi32>
    %116 = arith.sitofp %115 : vector<2x32xi32> to vector<2x32xf32>
    %c0_61 = arith.constant 0 : index
    %c0_62 = arith.constant 0 : index
    %117 = vector.load %arg9[%c0_61, %c0_62] : memref<32x32xf32, #tpu.memory_space<vmem>>, vector<32x32xf32>
    %cst_63 = arith.constant dense<0.000000e+00> : vector<2x32xf32>
    %118 = tpu.matmul %116, %117, %cst_63 {dimension_numbers = #tpu.dot_dimension_numbers<[1], [0], [0], [1], [0, 0, 1, 1], [], []>} : vector<2x32xf32>, vector<32x32xf32>, vector<2x32xf32> -> vector<2x32xf32>
    %c0_64 = arith.constant 0 : index
    %c0_65 = arith.constant 0 : index
    %119 = vector.load %arg21[%c0_64, %c0_65] : memref<2x32xf32, #tpu.memory_space<vmem>>, vector<2x32xf32>
    tpu.vector_store %arg21[%c0_64, %c0_65], %118 {strides = array<i32>} : memref<2x32xf32, #tpu.memory_space<vmem>>, vector<2x32xf32>,
    return
  }
  func.func @transform_0(%arg0: i32, %arg1: memref<7xi32, #tpu.memory_space<smem>>) -> (i32, i32, i32) {
    %c0_i32 = arith.constant 0 : i32
    %c0_i32_0 = arith.constant 0 : i32
    %c0_i32_1 = arith.constant 0 : i32
    return %arg0, %c0_i32, %c0_i32_0 : i32, i32, i32
  }
  func.func @transform_1(%arg0: i32, %arg1: memref<7xi32, #tpu.memory_space<smem>>) -> (i32, i32, i32) {
    %c0_i32 = arith.constant 0 : i32
    %c0_i32_0 = arith.constant 0 : i32
    %c0_i32_1 = arith.constant 0 : i32
    %c0_i32_2 = arith.constant 0 : i32
    return %c0_i32, %c0_i32_0, %c0_i32_1 : i32, i32, i32
  }
  func.func @transform_2(%arg0: i32, %arg1: memref<7xi32, #tpu.memory_space<smem>>) -> (i32, i32, i32) {
    %c0_i32 = arith.constant 0 : i32
    %c0_i32_0 = arith.constant 0 : i32
    %c0_i32_1 = arith.constant 0 : i32
    %c0_i32_2 = arith.constant 0 : i32
    return %c0_i32, %c0_i32_0, %c0_i32_1 : i32, i32, i32
  }
  func.func @transform_3(%arg0: i32, %arg1: memref<7xi32, #tpu.memory_space<smem>>) -> (i32, i32) {
    %c0_i32 = arith.constant 0 : i32
    %c0_i32_0 = arith.constant 0 : i32
    %c0_i32_1 = arith.constant 0 : i32
    return %c0_i32, %c0_i32_0 : i32, i32
  }
  func.func @transform_4(%arg0: i32, %arg1: memref<7xi32, #tpu.memory_space<smem>>) -> (i32, i32) {
    %c0_i32 = arith.constant 0 : i32
    %c0_i32_0 = arith.constant 0 : i32
    %c0_i32_1 = arith.constant 0 : i32
    return %c0_i32, %c0_i32_0 : i32, i32
  }
  func.func @transform_5(%arg0: i32, %arg1: memref<7xi32, #tpu.memory_space<smem>>) -> (i32, i32) {
    %c0_i32 = arith.constant 0 : i32
    %c0_i32_0 = arith.constant 0 : i32
    %c0_i32_1 = arith.constant 0 : i32
    return %c0_i32, %c0_i32_0 : i32, i32
  }
  func.func @transform_6(%arg0: i32, %arg1: memref<7xi32, #tpu.memory_space<smem>>) -> (i32, i32) {
    %c0_i32 = arith.constant 0 : i32
    %c0_i32_0 = arith.constant 0 : i32
    %c0_i32_1 = arith.constant 0 : i32
    return %c0_i32, %c0_i32_0 : i32, i32
  }
  func.func @transform_7(%arg0: i32, %arg1: memref<7xi32, #tpu.memory_space<smem>>) -> (i32, i32) {
    %c0_i32 = arith.constant 0 : i32
    %c0_i32_0 = arith.constant 0 : i32
    %c0_i32_1 = arith.constant 0 : i32
    return %c0_i32, %c0_i32_0 : i32, i32
  }
  func.func @transform_8(%arg0: i32, %arg1: memref<7xi32, #tpu.memory_space<smem>>) -> (i32, i32) {
    %c0_i32 = arith.constant 0 : i32
    %c0_i32_0 = arith.constant 0 : i32
    %c0_i32_1 = arith.constant 0 : i32
    return %c0_i32, %c0_i32_0 : i32, i32
  }
  func.func @transform_9(%arg0: i32, %arg1: memref<7xi32, #tpu.memory_space<smem>>) -> (i32, i32) {
    %c0_i32 = arith.constant 0 : i32
    %c0_i32_0 = arith.constant 0 : i32
    %c0_i32_1 = arith.constant 0 : i32
    return %c0_i32, %c0_i32_0 : i32, i32
  }
  func.func @transform_10(%arg0: i32, %arg1: memref<7xi32, #tpu.memory_space<smem>>) -> (i32, i32) {
    %c0_i32 = arith.constant 0 : i32
    %c0_i32_0 = arith.constant 0 : i32
    %c0_i32_1 = arith.constant 0 : i32
    return %c0_i32, %c0_i32_0 : i32, i32
  }
  func.func @transform_11(%arg0: i32, %arg1: memref<7xi32, #tpu.memory_space<smem>>) -> (i32, i32) {
    %c0_i32 = arith.constant 0 : i32
    %c0_i32_0 = arith.constant 0 : i32
    %c0_i32_1 = arith.constant 0 : i32
    return %c0_i32, %c0_i32_0 : i32, i32
  }
  func.func @transform_12(%arg0: i32, %arg1: memref<7xi32, #tpu.memory_space<smem>>) -> (i32, i32) {
    %c0_i32 = arith.constant 0 : i32
    %c0_i32_0 = arith.constant 0 : i32
    %c0_i32_1 = arith.constant 0 : i32
    return %c0_i32, %c0_i32_0 : i32, i32
  }
  func.func @transform_13(%arg0: i32, %arg1: memref<7xi32, #tpu.memory_space<smem>>) -> (i32, i32) {
    %c0_i32 = arith.constant 0 : i32
    %c0_i32_0 = arith.constant 0 : i32
    %c0_i32_1 = arith.constant 0 : i32
    return %c0_i32, %c0_i32_0 : i32, i32
  }
  func.func @transform_14(%arg0: i32, %arg1: memref<7xi32, #tpu.memory_space<smem>>) -> (i32, i32) {
    %c0_i32 = arith.constant 0 : i32
    %c0_i32_0 = arith.constant 0 : i32
    %c0_i32_1 = arith.constant 0 : i32
    return %c0_i32, %c0_i32_0 : i32, i32
  }
  func.func @transform_15(%arg0: i32, %arg1: memref<7xi32, #tpu.memory_space<smem>>) -> (i32, i32) {
    %c0_i32 = arith.constant 0 : i32
    %c0_i32_0 = arith.constant 0 : i32
    %c0_i32_1 = arith.constant 0 : i32
    return %c0_i32, %c0_i32_0 : i32, i32
  }
  func.func @transform_16(%arg0: i32, %arg1: memref<7xi32, #tpu.memory_space<smem>>) -> (i32, i32) {
    %c0_i32 = arith.constant 0 : i32
    %c0_i32_0 = arith.constant 0 : i32
    %c0_i32_1 = arith.constant 0 : i32
    return %c0_i32, %c0_i32_0 : i32, i32
  }
  func.func @transform_17(%arg0: i32, %arg1: memref<7xi32, #tpu.memory_space<smem>>) -> (i32, i32, i32) {
    %c0_i32 = arith.constant 0 : i32
    %c0_i32_0 = arith.constant 0 : i32
    %c0_i32_1 = arith.constant 0 : i32
    return %arg0, %c0_i32, %c0_i32_0 : i32, i32, i32
  }
}

</mosaic_0001>

<bundles_post_ra>
// kernel: _forward_jax.2
= control target key start
LH: loop header
LB: loop body
LE: loop exit
PB: predicated region body
PF: predicated region fallthrough
CT: control target
= control target key end

     0   :  { %v58_v0 = vlaneseq  ;;  %v670_v3 = vmov 1983009808   ;;  %vm87_vm0 = vcmask 261120   ;;  %v772_v43 = vmov 0.0   ;;  %s891_s1 = inlined_call_operand.vmem [shape: f32[32,128], index: 1, kind: input, shape index: {}]   ;;  %s892_s2 = inlined_call_operand.vmem [shape: f32[32,128], index: 2, kind: input, shape index: {}]   ;;  %s893_s4 = inlined_call_operand.vmem [shape: f32[1,128], index: 4, kind: input, shape index: {}]   ;;  %s894_s5 = inlined_call_operand.vmem [shape: f32[32,32], index: 5, kind: input, shape index: {}]   ;;  %s895_s6 = inlined_call_operand.vmem [shape: f32[8,2,32], index: 6, kind: output, shape index: {0}]   ;;  %s896_s7 = inlined_call_operand.vmem [shape: f32[8,2,32], index: 7, kind: output, shape index: {1}]   ;;  %s897_s8 = inlined_call_operand.vmem [shape: f32[2,32], index: 8, kind: output, shape index: {2}]   ;;  %s898_s0 = inlined_call_operand.vmem [shape: f32[8,2,32], index: 0, kind: input, shape index: {}]   ;;  %s899_s3 = inlined_call_operand.vmem [shape: f32[1,128], index: 3, kind: input, shape index: {}]  }
   0x1   :  { %v37_v1 = vld [vmem:[%s891_s1 + $0x18] sm:$0xff]  ;;  %v36_v2 = vld [vmem:[%s891_s1 + $0x10] sm:$0xff]  ;;  %v56_v4 = vunpack.c.l.s4 %v670_v3  ;;  %v35_v5 = vld [vmem:[%s891_s1 + $0x8] sm:$0xff] }
   0x2   :  { %593 = vmatprep.subr.mxu0 %v37_v1  ;;  %v26_v6 = vld [vmem:[%s898_s0] sm:$0x3]  ;;  %v27_v7 = vld [vmem:[%s898_s0 + $0x2] sm:$0x3]  ;;  %v59_v8 = vshrl.u32 %v58_v0, 7 }
   0x3   :  { %594 = vmatpush3.msra.mxu0 %v37_v1  ;;  %v28_v9 = vld [vmem:[%s898_s0 + $0x4] sm:$0x3]  ;;  %v29_v10 = vld [vmem:[%s898_s0 + $0x6] sm:$0x3]  ;;  %v53_v11 = vcombine.low %v26_v6, %v27_v7  ;;  %v57_v12 = vunpack.c.0.s8 %v56_v4  ;;  %v30_v13 = vld [vmem:[%s898_s0 + $0x8] sm:$0x3] }
   0x4   :  { %595 = vmatprep.subr.mxu0 %v36_v2  ;;  %v54_v14 = vcombine.low %v28_v9, %v29_v10  ;;  %v31_v15 = vld [vmem:[%s898_s0 + $0xa] sm:$0x3]  ;;  %v32_v16 = vld [vmem:[%s898_s0 + $0xc] sm:$0x3]  ;;  %v33_v17 = vld [vmem:[%s898_s0 + $0xe] sm:$0x3] }
   0x5   :  { %596 = vmatpush3.msra.mxu0 %v36_v2  ;;  %v34_v18 = vld [vmem:[%s891_s1] sm:$0xff]  ;;  %v757_v19 = vsub.s32 %v57_v12, %v59_v8  ;;  %v70_v20 = vcombine.low %v30_v13, %v31_v15  ;;  %v71_v21 = vcombine.low %v32_v16, %v33_v17 }
   0x6   :  { %597 = vmatprep.subr.mxu0 %v35_v5  ;;  %v563_v28 = vld [vmem:[%s899_s3] ss:$0 sm:$0xff]  ;;  %s774_s3 = smov 0  }
   0x7   :  { %598 = vmatpush3.msra.mxu0 %v35_v5  ;;  %v61_v22 = vrot.slane %v53_v11, %v757_v19  ;;  %v68_v23 = vrot.slane %v54_v14, %v757_v19  ;;  %v78_v24 = vrot.slane %v70_v20, %v757_v19  ;;  %v85_v25 = vrot.slane %v71_v21, %v757_v19 }
   0x8   :  { %599 = vmatprep.subr.mxu0 %v34_v18 }
   0x9   :  { %600 = vmatpush3.msra.mxu0 %v34_v18  ;;  %v69_v26 = vcombine.low %v61_v22, %v68_v23  ;;  %v86_v27 = vcombine.low %v78_v24, %v85_v25 }
   0xb   :  { %601 = vmatprep.mubr.msk.f32.mxu0 %vm87_vm0, %v69_v26 }
   0xc   :  { %602 = vmatmul.mubr.msk.f32.vlgmr.msra.gmra.mxu0 %vm87_vm0, %v86_v27 }
  0xcc   :  { %v603_v29 = vpop.f32.mrf.mxu0 }
  0xcd   :  { %v164_v30 = vadd.f32 %v603_v29, %v563_v28 }
  0xce   :  { %v158_v31 = vpop.f32.mrf.mxu0 }
  0xcf   :  { %v186_v32 = vcombine.high %v164_v30, %v164_v30  ;;  %v193_v33 = vrot.slane %v164_v30, %v757_v19  ;;  %568 = vst.sshfl [vmem:[#allocation2 + $0x8] sm:$0x3 pattern:$0x76325410] %v164_v30  ;;  %v159_v34 = vadd.f32 %v563_v28, %v158_v31 }
  0xd1   :  { %v200_v35 = vrot.slane %v186_v32, %v757_v19  ;;  %v201_v36 = vcombine.high %v193_v33, %v193_v33  ;;  %569 = vst.sshfl [vmem:[#allocation2 + $0xc] sm:$0x3 pattern:$0x76325410] %v186_v32  ;;  %v169_v37 = vcombine.high %v159_v34, %v159_v34  ;;  %v176_v38 = vrot.slane %v159_v34, %v757_v19 }
  0xd2   :  { %566 = vst.sshfl [vmem:[#allocation2] sm:$0x3 pattern:$0x76325410] %v159_v34 }
  0xd3   :  { %v202_v39 = vcombine.high %v200_v35, %v200_v35  ;;  %216 = vst [vmem:[#allocation2 + $0xa] sm:$0x3] %v201_v36  ;;  %v183_v40 = vrot.slane %v169_v37, %v757_v19  ;;  %v184_v41 = vcombine.high %v176_v38, %v176_v38  ;;  %567 = vst.sshfl [vmem:[#allocation2 + $0x4] sm:$0x3 pattern:$0x76325410] %v169_v37 }
  0xd5   :  { %218 = vst [vmem:[#allocation2 + $0xe] sm:$0x3] %v202_v39  ;;  %v185_v42 = vcombine.high %v183_v40, %v183_v40  ;;  %212 = vst [vmem:[#allocation2 + $0x2] sm:$0x3] %v184_v41 }
  0xd7   :  { %214 = vst [vmem:[#allocation2 + $0x6] sm:$0x3] %v185_v42 }
  0xd8 LB: > { %v232_v44 = vld [vmem:[%s892_s2 + $0x18] sm:$0xff]  ;;  %v671_v45 = vmov 0.0   ;;  %v231_v46 = vld [vmem:[%s892_s2 + $0x10] sm:$0xff]  ;;  %vm672_vm1 = vmmov 0   ;;  %s673_s11 = smov 96   ;;  %v230_v47 = vld [vmem:[%s892_s2 + $0x8] sm:$0xff]  ;;  %s668_s3 = sphi %s774_s3, %s224_s3   ;;  %v664_v43 = vphi %v772_v43, %v900_v43  }
  0xd9   : > { %604 = vmatprep.subr.mxu0 %v671_v45  ;;  %612 = vmatprep.mubr.msk.f32.mxu0 %vm672_vm1, %v671_v45  ;;  %v229_v48 = vld [vmem:[%s892_s2] sm:$0xff]  ;;  %s674_s18 = smov 64   ;;  %s570_s19 = sshll.u32 %s668_s3, 1  ;;  %vm346_vm2 = vcmask 254976  }
  0xda   : > { %241 = vrot.lane.b32.xlu0 %v664_v43, %s673_s11  ;;  %605 = vmatpush3.msra.mxu0 %v232_v44  ;;  %v571_v50 = vld [vmem:[%s893_s4] ss:$0 sm:$0xff]  ;;  %s227_s20 = scalar_lea.vmem [#allocation2], %s570_s19  ;;  %s345_s23 = scalar_lea.vmem %s895_s6, %s570_s19 }
  0xdb   : > { %606 = vmatprep.subr.mxu0 %v671_v45  ;;  %s224_s3 = sadd.s32 1, %s668_s3  }
  0xdc   : > { %607 = vmatpush3.msra.mxu0 %v231_v46  ;;  %p221_p0 = scmp.ge.s32.totalorder %s224_s3, 8  }
  0xdd   : > { %608 = vmatprep.subr.mxu0 %v671_v45  ;;  %v365_v7 = vld [vmem:[%s894_s5 + $0x18] sm:$0xff] (%p221_p0)  ;;  %v364_v8 = vld [vmem:[%s894_s5 + $0x10] sm:$0xff] (%p221_p0)  ;;  %v363_v9 = vld [vmem:[%s894_s5 + $0x8] sm:$0xff] (%p221_p0)  ;;  %s675_s2 = smov (%p221_p0), 96  }
  0xde   : > { %609 = vmatpush3.msra.mxu0 %v230_v47  ;;  %v228_v54 = vld [vmem:[%s227_s20] sm:$0x3] }
  0xdf   : > { %610 = vmatprep.subr.mxu0 %v671_v45  ;;  %v362_v21 = vld [vmem:[%s894_s5] sm:$0xff] (%p221_p0) }
  0xe0   : > { %611 = vmatpush3.msra.mxu0 %v229_v48 }
  0xe1   :  { %615 = vmatprep.subr.mxu0 (%p221_p0), %v365_v7 }
 0x14c   : > { %v242_v49 = vpop.permute.xlu0 %241 }
 0x14d   : > { %613 = vmatmul.mubr.msk.f32.vlgmr.msra.gmra.mxu0 %vm87_vm0, %v242_v49 }
 0x14e   :  { %616 = vmatpush3.msra.mxu0 (%p221_p0), %v365_v7 }
 0x14f   :  { %617 = vmatprep.subr.mxu0 (%p221_p0), %v364_v8 }
 0x150   :  { %618 = vmatpush3.msra.mxu0 (%p221_p0), %v364_v8 }
 0x151   :  { %619 = vmatprep.subr.mxu0 (%p221_p0), %v363_v9 }
 0x152   :  { %620 = vmatpush3.msra.mxu0 (%p221_p0), %v363_v9 }
 0x153   :  { %621 = vmatprep.subr.mxu0 (%p221_p0), %v362_v21 }
 0x154   :  { %622 = vmatpush3.msra.mxu0 (%p221_p0), %v362_v21 }
 0x20d   : > { %v311_v51 = vpop.f32.mrf.mxu0 }
 0x20e   : > { %v312_v52 = vadd.f32 %v571_v50, %v311_v51 }
 0x20f   : > { %v614_v53 = vpop.f32.mrf.mxu0 }
 0x210   : > { %323 = vrot.lane.b32.xlu0 %v312_v52, %s674_s18  ;;  %v315_v55 = vadd.f32 %v312_v52, %v228_v54 }
 0x212   : > { %v573_v56 = vmul.f32 -1.442695, %v315_v55 }
 0x214   : > { %648 = vpow2.f32 %v573_v56 }
 0x221   : > { %v649_v57 = vpop.eup %648 }
 0x222   : > { %v319_v58 = vadd.f32 1.0, %v649_v57 }
 0x224   : > { %650 = vrcp.f32 %v319_v58 }
 0x231   : > { %v651_v59 = vpop.eup %650 }
 0x232   : > { %v333_v1 = vsub.f32 1.0, %v651_v59  ;;  %v339_v3 = vmul.f32 %v664_v43, %v651_v59 }
 0x282   : > { %v324_v60 = vpop.permute.xlu0 %323 }
 0x283   : > { %v326_v61 = vmul.f32 %v651_v59, %v324_v60 }
 0x285   : > { %328 = vrot.lane.b32.xlu1 %v326_v61, %s674_s18 }
 0x2f7   : > { %v329_v62 = vpop.permute.xlu1 %328 }
 0x2f8   : > { %v331_v63 = vadd.f32 %v329_v62, %v228_v54 }
 0x2fa   : > { %652 = vtanh.f32 %v331_v63 }
 0x307   : > { %v653_v0 = vpop.eup %652 }
 0x308   : > { %335 = vrot.lane.b32.xlu1 %v653_v0, %s673_s11 }
 0x37a   : > { %v336_v2 = vpop.permute.xlu1 %335 }
 0x37b   : > { %v338_v4 = vmul.f32 %v336_v2, %v333_v1 }
 0x37d   : > { %v340_v5 = vadd.f32 %v339_v3, %v338_v4  }
 0x37f   : > { %342 = vrot.lane.b32.xlu0 %v340_v5, %s673_s11  ;;  %v900_v43 = vmov %v340_v5 }
 0x383   :  { %349 = vrot.lane.b32.xlu0 (%p221_p0), %v340_v5, %s675_s2 }
 0x3ee   :  { %223 = sbr.rel (!%p221_p0) target bundleno = 216 (0xd8), region = 69 }
 0x3f1   : > { %v343_v6 = vpop.permute.xlu0 %342 }
 0x3f2   : > { %347 = vst.msk [vmem:[%s345_s23] sm:$0x3] %vm346_vm2, %v343_v6 }
 0x3f5   :  { %v350_v30 = vpop.permute.xlu0 %349 }
 0x3f6   :  { %353 = vst.msk [vmem:[%s897_s8] sm:$0x3] %vm346_vm2, %v350_v30 }
 0x3f9   :  { %v354_v10 = vld [vmem:[%s895_s6] sm:$0x3]  ;;  %v355_v11 = vld [vmem:[%s895_s6 + $0x2] sm:$0x3]  ;;  %v356_v12 = vld [vmem:[%s895_s6 + $0x4] sm:$0x3] }
 0x3fa   :  { %v357_v13 = vld [vmem:[%s895_s6 + $0x6] sm:$0x3]  ;;  %v374_v14 = vcombine.low %v354_v10, %v355_v11  ;;  %v358_v15 = vld [vmem:[%s895_s6 + $0x8] sm:$0x3]  ;;  %v359_v17 = vld [vmem:[%s895_s6 + $0xa] sm:$0x3] }
 0x3fb   :  { %v375_v16 = vcombine.low %v356_v12, %v357_v13  ;;  %v360_v18 = vld [vmem:[%s895_s6 + $0xc] sm:$0x3]  ;;  %v361_v20 = vld [vmem:[%s895_s6 + $0xe] sm:$0x3]  ;;  %v391_v23 = vcombine.low %v358_v15, %v359_v17 }
 0x3fc   :  { %v382_v22 = vrot.slane %v374_v14, %v757_v19  ;;  %v392_v24 = vcombine.low %v360_v18, %v361_v20 }
 0x3fd   :  { %v389_v25 = vrot.slane %v375_v16, %v757_v19  ;;  %v399_v26 = vrot.slane %v391_v23, %v757_v19 }
 0x3fe   :  { %v406_v27 = vrot.slane %v392_v24, %v757_v19 }
 0x3ff   :  { %v390_v28 = vcombine.low %v382_v22, %v389_v25 }
 0x400   :  { %v407_v29 = vcombine.low %v399_v26, %v406_v27 }
 0x401   :  { %623 = vmatprep.mubr.msk.f32.mxu0 %vm87_vm0, %v390_v28 }
 0x402   :  { %624 = vmatmul.mubr.msk.f32.vlgmr.msra.gmra.mxu0 %vm87_vm0, %v407_v29 }
 0x4c2   :  { %v625_v31 = vpop.f32.mrf.mxu0 }
 0x4c3   :  { %v506_v32 = vcombine.high %v625_v31, %v625_v31  ;;  %v513_v33 = vrot.slane %v625_v31, %v757_v19 }
 0x4c4   :  { %v478_v34 = vpop.f32.mrf.mxu0 }
 0x4c5   :  { %v520_v35 = vrot.slane %v506_v32, %v757_v19  ;;  %v521_v36 = vcombine.high %v513_v33, %v513_v33  ;;  %535 = vst.msk [vmem:[%s896_s7 + $0x8] sm:$0x3] %vm346_vm2, %v513_v33  ;;  %v489_v37 = vcombine.high %v478_v34, %v478_v34  ;;  %v496_v38 = vrot.slane %v478_v34, %v757_v19 }
 0x4c7   :  { %v522_v39 = vcombine.high %v520_v35, %v520_v35  ;;  %536 = vst.msk [vmem:[%s896_s7 + $0xa] sm:$0x3] %vm346_vm2, %v521_v36  ;;  %537 = vst.msk [vmem:[%s896_s7 + $0xc] sm:$0x3] %vm346_vm2, %v520_v35  ;;  %v503_v40 = vrot.slane %v489_v37, %v757_v19  ;;  %v504_v41 = vcombine.high %v496_v38, %v496_v38 }
 0x4c8   :  { %531 = vst.msk [vmem:[%s896_s7] sm:$0x3] %vm346_vm2, %v496_v38 }
 0x4c9   :  { %538 = vst.msk [vmem:[%s896_s7 + $0xe] sm:$0x3] %vm346_vm2, %v522_v39  ;;  %v505_v42 = vcombine.high %v503_v40, %v503_v40  ;;  %532 = vst.msk [vmem:[%s896_s7 + $0x2] sm:$0x3] %vm346_vm2, %v504_v41 }
 0x4ca   :  { %533 = vst.msk [vmem:[%s896_s7 + $0x4] sm:$0x3] %vm346_vm2, %v503_v40 }
 0x4cb   :  { %534 = vst.msk [vmem:[%s896_s7 + $0x6] sm:$0x3] %vm346_vm2, %v505_v42 }

// kernel: _forward_jax.3
= control target key start
LH: loop header
LB: loop body
LE: loop exit
PB: predicated region body
PF: predicated region fallthrough
CT: control target
= control target key end

     0   :  { %s2169_s0 = inlined_call_operand.vmem [shape: s32[7], index: 0, kind: input, shape index: {}]   ;;  %s2170_s1 = inlined_call_operand.vmem [shape: f32[7,2,32], index: 1, kind: input, shape index: {}]   ;;  %s2171_s2 = inlined_call_operand.vmem [shape: f32[8,2,32], index: 2, kind: input, shape index: {}]   ;;  %s2172_s3 = inlined_call_operand.vmem [shape: f32[8,2,32], index: 3, kind: input, shape index: {}]   ;;  %s2173_s4 = inlined_call_operand.vmem [shape: f32[8,2], index: 4, kind: input, shape index: {}]   ;;  %s2174_s5 = inlined_call_operand.vmem [shape: f32[2,32], index: 5, kind: input, shape index: {}]   ;;  %s2175_s6 = inlined_call_operand.vmem [shape: f32[32,32], index: 6, kind: input, shape index: {}]   ;;  %s2176_s7 = inlined_call_operand.vmem [shape: f32[1,32], index: 7, kind: input, shape index: {}]   ;;  %s2177_s8 = inlined_call_operand.vmem [shape: f32[32,32], index: 8, kind: input, shape index: {}]   ;;  %s2178_s9 = inlined_call_operand.vmem [shape: f32[32,128], index: 9, kind: input, shape index: {}]   ;;  %s2179_s10 = inlined_call_operand.vmem [shape: f32[32,128], index: 10, kind: input, shape index: {}]   ;;  %s2180_s11 = inlined_call_operand.vmem [shape: f32[32,128], index: 11, kind: input, shape index: {}]   ;;  %s2181_s12 = inlined_call_operand.vmem [shape: f32[1,128], index: 12, kind: input, shape index: {}]   ;;  %s2182_s13 = inlined_call_operand.vmem [shape: f32[1,128], index: 13, kind: input, shape index: {}]   ;;  %s2183_s14 = inlined_call_operand.vmem [shape: f32[32,128], index: 14, kind: input, shape index: {}]   ;;  %s2184_s15 = inlined_call_operand.vmem [shape: f32[32,128], index: 15, kind: input, shape index: {}]   ;;  %s2185_s16 = inlined_call_operand.vmem [shape: f32[32,128], index: 16, kind: input, shape index: {}]   ;;  %s2186_s17 = inlined_call_operand.vmem [shape: f32[1,128], index: 17, kind: input, shape index: {}]   ;;  %s2187_s18 = inlined_call_operand.vmem [shape: f32[7,2,128], index: 18, kind: output, shape index: {}]  }
   0x1   :  { %2190 = sst [smem:[#allocation7_spill]] %s2169_s0 }
   0x2   :  { %2191 = sst [smem:[#allocation8_spill]] %s2170_s1 }
   0x3   :  { %2192 = sst [smem:[#allocation9_spill]] %s2171_s2 }
   0x4   :  { %2193 = sst [smem:[#allocation10_spill]] %s2177_s8 }
   0x5   :  { %s2194_s29 = sld [smem:[#allocation7_spill]] }
   0xb   :  { %s23_s8 = sshll.u32 %s2194_s29, 4  ;;  %s24_s8 = int_to_ptr.vmem [resolvable:$true] %s23_s8 }
   0xc   :  { %s1738_s30 = scalar_lea.vmem %s24_s8, 16  ;;  %p1743_p1 = scmp.lt.s32.totalorder %s24_s8, %s24_s8 }
   0xd   :  { %p1739_p0 = scmp.ne.s32.totalorder %s24_s8, %s1738_s30  ;;  %p1744_p2 = scmp.lt.s32.totalorder %s1738_s30, %s1738_s30 }
   0xf   :  { %p1745_p3 = por %p1744_p2, %p1743_p1 }
  0x11   :  { %p1746_p4 = pnand %p1745_p3, %p1739_p0 }
  0x13   :  { %1749 = shalt.err (!%p1746_p4)  }
  0x14   :  { %s1760_s0 = smov [#allocation5]  }
  0x15   :  { %26 = dma.vmem_to_smem %s24_s8, 16, %s1760_s0, [#allocation4] }
  0x16   :  { %1754 = dma.done.wait [#allocation4], 16 }
  0x17   :  { %1755 = vsyncadd [#allocation4], 4294967280 }
  0x18   :  { %28 = sfence }
  0x19   :  { %s1864_s19 = smov 0  }
  0x1a LB: > { %s1870_s1 = sadd.s32 4294967295, %s1758_s19   ;;  %p1550_p5 = scmp.ge.s32.totalorder %s1758_s19, 1  ;;  %s1758_s19 = sphi %s1864_s19, %s34_s19  }
  0x1b   : > { %p493_p6 = scmp.lt.s32.totalorder %s1758_s19, 8 }
  0x1d   : > { %p494_p7 = pnand %p1550_p5, %p493_p6 }
  0x1e   : > { %p543_p8 = scmp.lt.s32.totalorder (!%p494_p7), %s1870_s1, 6  ;;  %p552_p9 = scmp.eq.s32.totalorder (!%p494_p7), %s1870_s1, 0 }
  0x1f   : > { %497 = sbr.rel (%p494_p7) target bundleno = 2129 (0x851), region = 88  ;;  %s2195_s2 = sld [smem:[#allocation8_spill]] (!%p494_p7) }
  0x20   : > { %p1553_p10 = scmp.ne.s32.totalorder (!%p494_p7), %s1870_s1, 0 }
  0x24   : > { %s544_s8 = scalar_select %p543_p8, %s1870_s1, 6 }
  0x25   : > { %555 = sbr.rel (%p1553_p10) target bundleno = 44 (0x2c), region = 92 }
  0x26   : > { %s1551_s20 = sshll.u32 %s544_s8, 1 }
  0x27   : > { %s546_s23 = scalar_lea.vmem %s2195_s2, %s1551_s20  ;;  %s1883_s26 = scalar_lea.vmem %s2187_s18, %s1551_s20 }
  0x28   : > { %v1885_v0 = vld [vmem:[%s546_s23] sm:$0x3] }
  0x2a   : > { %v556_v1 = vld [vmem:[%s2174_s5] sm:$0x3]  ;;  %vm557_vm0 = vcmask 254976  }
  0x2b   : > { %558 = vst.msk [vmem:[#allocation2] sm:$0x3] %vm557_vm0, %v556_v1  ;;  %559 = vst.msk [vmem:[#allocation3] sm:$0x3] %vm557_vm0, %v1885_v0 }
  0x2c PF: > { %v572_v2 = vld [vmem:[%s2175_s6 + $0x18] sm:$0xff]  ;;  %v1761_v3 = vmov 0.0   ;;  %v571_v4 = vld [vmem:[%s2175_s6 + $0x10] sm:$0xff]  ;;  %vm1762_vm1 = vmmov 0   ;;  %v570_v5 = vld [vmem:[%s2175_s6 + $0x8] sm:$0xff]  ;;  %vm573_vm2 = vcmask 261120   ;;  %v721_v51 = vlaneseq }
  0x2d   : > { %1610 = vmatprep.subr.mxu0 %v1761_v3  ;;  %1618 = vmatprep.mubr.msk.f32.mxu0 %vm1762_vm1, %v1761_v3  ;;  %v569_v6 = vld [vmem:[%s2175_s6] sm:$0xff]  ;;  %v652_v13 = vld [vmem:[%s2172_s3 + $0xa] sm:$0x3]  ;;  %v651_v17 = vld [vmem:[%s2172_s3 + $0x8] sm:$0x3]  ;;  %vm686_vm3 = vcmask 254976  }
  0x2e   : > { %1611 = vmatpush3.msra.mxu0 %v572_v2  ;;  %1621 = vmatprep.subr.mxu1 %v1761_v3  ;;  %v649_v8 = vld [vmem:[%s2172_s3 + $0x4] sm:$0x3]  ;;  %v647_v9 = vld [vmem:[%s2172_s3] sm:$0x3]  ;;  %v650_v10 = vld [vmem:[%s2172_s3 + $0x6] sm:$0x3] }
  0x2f   : > { %1612 = vmatprep.subr.mxu0 %v1761_v3  ;;  %1629 = vmatprep.mubr.msk.f32.mxu1 %vm1762_vm1, %v1761_v3  ;;  %v648_v11 = vld [vmem:[%s2172_s3 + $0x2] sm:$0x3]  ;;  %v654_v22 = vld [vmem:[%s2172_s3 + $0xe] sm:$0x3]  ;;  %v653_v23 = vld [vmem:[%s2172_s3 + $0xc] sm:$0x3] }
  0x30   : > { %1613 = vmatpush3.msra.mxu0 %v571_v4  ;;  %v1555_v26 = vld [vmem:[%s2176_s7] ss:$0 sm:$0xff]  ;;  %v1955_v52 = vand.u32 127, %v721_v51  ;;  %v1957_v53 = vshrl.u32 %v721_v51, 7  ;;  %vm755_vm4 = vcmask 1041409   ;;  %vm757_vm5 = vcmask 1042434  }
  0x31   : > { %1614 = vmatprep.subr.mxu0 %v1761_v3  ;;  %vm759_vm6 = vcmask 1043459   ;;  %vm761_vm7 = vcmask 1044484   ;;  %vm763_vm8 = vcmask 1045509   ;;  %vm765_vm9 = vcmask 1046534   ;;  %s560_s0 = sld [smem:[#allocation5 + %s1870_s1]]  ;;  %v878_v51 = vld [vmem:[%s2178_s9] sm:$0xff] }
  0x32   : > { %1615 = vmatpush3.msra.mxu0 %v570_v5  ;;  %v1912_v7 = vld [vmem:[#allocation2] sm:$0x3]  ;;  %v725_v56 = vsub.s32 %v1955_v52, %v1957_v53  ;;  %vm767_vm10 = vcmask 1047559   ;;  %vm771_vm12 = vcmask 15360   ;;  %s2197_s8 = sld [smem:[#allocation9_spill]]  ;;  %s1763_s30 = smov 64  }
  0x33   : > { %1616 = vmatprep.subr.mxu0 %v1761_v3  ;;  %s1764_s21 = smov 32   ;;  %s1765_s24 = smov 96   ;;  %vm1389_vm14 = vcmp.lt.s32.totalorder %v1955_v52, 32  ;;  %vm1391_vm15 = vcmask 1041408  }
  0x34   : > { %1617 = vmatpush3.msra.mxu0 %v569_v6 }
  0x35   : > { %1619 = vmatmul.mubr.msk.f32.vlgmr.msra.gmra.mxu0 %vm573_vm2, %v1912_v7  ;;  %1632 = vmatprep.subr.mxu0 %v1761_v3 }
  0x36   : > { %1640 = vmatprep.mubr.msk.f32.mxu0 %vm1762_vm1, %v1761_v3 }
  0x37   : > { %p561_p11 = scmp.eq.s32.totalorder %s560_s0, 1 }
  0x39   : > { %p1981_p12 = por %p561_p11, %p552_p9 }
  0x3b   : > { %s564_s29 = scalar_select %p1981_p12, 1, 0 }
  0xf5   : > { %v643_v12 = vpop.f32.mrf.mxu0 }
  0xf6   : > { %v657_v14 = vadd.f32 %v649_v8, %v643_v12  ;;  %v655_v15 = vadd.f32 %v647_v9, %v643_v12  ;;  %v658_v16 = vadd.f32 %v650_v10, %v643_v12  ;;  %v656_v19 = vadd.f32 %v648_v11, %v643_v12  ;;  %v711_v11 = vld [vmem:[%s2173_s4] sm:$0xff] }
  0xf7   : > { %v1620_v18 = vpop.f32.mrf.mxu0  ;;  %v660_v20 = vadd.f32 %v652_v13, %v643_v12  ;;  %v659_v21 = vadd.f32 %v651_v17, %v643_v12  ;;  %v662_v24 = vadd.f32 %v654_v22, %v643_v12  ;;  %v661_v25 = vadd.f32 %v653_v23, %v643_v12 }
  0xf8   : > { %1712 = vtanh.f32 %v657_v14  ;;  %vm712_vm11 = vcmp.gt.f32.partialorder %v711_v11, 0.5 }
  0xf9   : > { %1714 = vtanh.f32 %v655_v15 }
  0xfa   : > { %1716 = vtanh.f32 %v658_v16 }
  0xfb   : > { %1718 = vtanh.f32 %v656_v19 }
  0xfc   : > { %1720 = vtanh.f32 %v660_v20 }
  0xfd   : > { %1722 = vtanh.f32 %v659_v21 }
  0xfe   : > { %1724 = vtanh.f32 %v662_v24 }
  0xff   : > { %1726 = vtanh.f32 %v661_v25 }
 0x105   : > { %v1713_v27 = vpop.eup %1712 }
 0x106   : > { %v1715_v28 = vpop.eup %1714  ;;  %v680_v29 = vmul.f32 %v1713_v27, %v1555_v26 }
 0x107   : > { %v1717_v30 = vpop.eup %1716  ;;  %v678_v31 = vmul.f32 %v1715_v28, %v1555_v26 }
 0x108   : > { %v1719_v32 = vpop.eup %1718  ;;  %v693_v33 = vsel %vm686_vm3, %v680_v29, 0.0  ;;  %v681_v34 = vmul.f32 %v1717_v30, %v1555_v26 }
 0x109   : > { %v1721_v35 = vpop.eup %1720  ;;  %694 = vadd.xlane.f32.xlu1 %v693_v33  ;;  %v687_v36 = vsel %vm686_vm3, %v678_v31, 0.0  ;;  %v679_v37 = vmul.f32 %v1719_v32, %v1555_v26 }
 0x10a   : > { %v1723_v38 = vpop.eup %1722  ;;  %688 = vadd.xlane.f32.xlu0 %v687_v36  ;;  %v696_v39 = vsel %vm686_vm3, %v681_v34, 0.0  ;;  %v683_v40 = vmul.f32 %v1721_v35, %v1555_v26  ;;  %v800_v36 = vsub.s32 1, %v1957_v53 }
 0x10b   : > { %v1725_v41 = vpop.eup %1724  ;;  %v690_v42 = vsel %vm686_vm3, %v679_v37, 0.0  ;;  %v682_v43 = vmul.f32 %v1723_v38, %v1555_v26  ;;  %v793_v37 = vsub.s32 0, %v1957_v53  ;;  %v881_v38 = vld [vmem:[%s2178_s9 + $0x18] sm:$0xff] }
 0x10c   : > { %v1727_v44 = vpop.eup %1726  ;;  %v702_v45 = vsel %vm686_vm3, %v683_v40, 0.0  ;;  %v685_v46 = vmul.f32 %v1725_v41, %v1555_v26  ;;  %1633 = vmatpush3.msra.mxu0 %v881_v38  ;;  %v854_v38 = vld [vmem:[%s2197_s8 + $0xe] sm:$0x3] }
 0x10d   : > { %697 = vadd.xlane.f32.xlu1 %v696_v39  ;;  %v699_v47 = vsel %vm686_vm3, %v682_v43, 0.0  ;;  %v684_v48 = vmul.f32 %v1727_v44, %v1555_v26  ;;  %1634 = vmatprep.subr.mxu0 %v1761_v3  ;;  %v807_v43 = vsub.s32 2, %v1957_v53  ;;  %v821_v44 = vsub.s32 4, %v1957_v53 }
 0x10e   : > { %691 = vadd.xlane.f32.xlu0 %v690_v42  ;;  %v708_v49 = vsel %vm686_vm3, %v685_v46, 0.0  ;;  %v879_v46 = vld [vmem:[%s2178_s9 + $0x8] sm:$0xff] }
 0x10f   : > { %v705_v50 = vsel %vm686_vm3, %v684_v48, 0.0 }
 0x111   : > { %703 = vadd.xlane.f32.xlu1 %v702_v45  ;;  %v880_v45 = vld [vmem:[%s2178_s9 + $0x10] sm:$0xff] }
 0x112   : > { %700 = vadd.xlane.f32.xlu0 %v699_v47  ;;  %1635 = vmatpush3.msra.mxu0 %v880_v45 }
 0x113   : > { %1636 = vmatprep.subr.mxu0 %v1761_v3 }
 0x114   : > { %1637 = vmatpush3.msra.mxu0 %v879_v46 }
 0x115   : > { %709 = vadd.xlane.f32.xlu1 %v708_v49  ;;  %v814_v49 = vsub.s32 3, %v1957_v53  ;;  %1638 = vmatprep.subr.mxu0 %v1761_v3 }
 0x116   : > { %706 = vadd.xlane.f32.xlu0 %v705_v50  ;;  %v835_v50 = vsub.s32 6, %v1957_v53  ;;  %1639 = vmatpush3.msra.mxu0 %v878_v51 }
 0x117   : > { %1654 = vmatprep.subr.mxu0 %v1761_v3 }
 0x192   : > { %v695_v54 = vpop.xlane.xlu1 %694 }
 0x193   : > { %v689_v55 = vpop.xlane.xlu0 %688  ;;  %v734_v61 = vrot.slane %v695_v54, %v725_v56  ;;  %v885_v54 = vld [vmem:[%s2179_s10 + $0x18] sm:$0xff] }
 0x194   : > { %v726_v59 = vrot.slane %v689_v55, %v725_v56  ;;  %1622 = vmatpush3.msra.mxu1 %v885_v54  ;;  %v563_v55 = vld [vmem:[#allocation3] sm:$0x3] }
 0x195   : > { %1623 = vmatprep.subr.mxu1 %v1761_v3 }
 0x196   : > { %v698_v57 = vpop.xlane.xlu1 %697 }
 0x197   : > { %v692_v58 = vpop.xlane.xlu0 %691  ;;  %v738_v62 = vrot.slane %v698_v57, %v725_v56  ;;  %v565_v57 = vstv %s564_s29  ;;  %s2198_s29 = sld [smem:[#allocation10_spill]] }
 0x198   : > { %v730_v60 = vrot.slane %v692_v58, %v725_v56  ;;  %vm566_vm13 = vcmp.eq.s32.totalorder %v565_v57, 1 }
 0x19a   : > { %v756_v63 = vsel %vm755_vm4, %v730_v60, %v726_v59  ;;  %v704_v1 = vpop.xlane.xlu1 %703  ;;  %v828_v60 = vsub.s32 5, %v1957_v53 }
 0x19b   : > { %v758_v2 = vsel %vm757_vm5, %v734_v61, %v756_v63  ;;  %v701_v4 = vpop.xlane.xlu0 %700  ;;  %v746_v8 = vrot.slane %v704_v1, %v725_v56  ;;  %v2004_v61 = vsel %vm566_vm13, %v1885_v0, %v563_v55  ;;  %v883_v63 = vld [vmem:[%s2179_s10 + $0x8] sm:$0xff]  ;;  %v1161_v0 = vld [vmem:[%s2184_s15 + $0x10] sm:$0xff]  ;;  %v882_v1 = vld [vmem:[%s2179_s10] sm:$0xff] }
 0x19c   : > { %v760_v5 = vsel %vm759_vm6, %v738_v62, %v758_v2  ;;  %v742_v6 = vrot.slane %v701_v4, %v725_v56  ;;  %v1162_v62 = vld [vmem:[%s2184_s15 + $0x18] sm:$0xff]  ;;  %1641 = vmatmul.mubr.msk.f32.vlgmr.msra.gmra.mxu0 %vm573_vm2, %v2004_v61  ;;  %v842_v4 = vsub.s32 7, %v1957_v53 }
 0x19d   : > { %1655 = vmatpush3.msra.mxu0 %v1162_v62  ;;  %1662 = vmatprep.mubr.msk.f32.mxu0 %vm1762_vm1, %v1761_v3 }
 0x19e   : > { %v762_v9 = vsel %vm761_vm7, %v742_v6, %v760_v5  ;;  %v710_v10 = vpop.xlane.xlu1 %709  ;;  %1656 = vmatprep.subr.mxu0 %v1761_v3  ;;  %v1160_v5 = vld [vmem:[%s2184_s15 + $0x8] sm:$0xff]  ;;  %v1159_v6 = vld [vmem:[%s2184_s15] sm:$0xff] }
 0x19f   : > { %v754_v12 = vrot.slane %v710_v10, %v725_v56  ;;  %v707_v13 = vpop.xlane.xlu0 %706  ;;  %v764_v15 = vsel %vm763_vm8, %v746_v8, %v762_v9  ;;  %1657 = vmatpush3.msra.mxu0 %v1161_v0  ;;  %v848_v8 = vld [vmem:[%s2197_s8 + $0x2] sm:$0x3]  ;;  %v847_v9 = vld [vmem:[%s2197_s8] sm:$0x3] }
 0x1a0   : > { %v750_v14 = vrot.slane %v707_v13, %v725_v56  ;;  %v884_v56 = vld [vmem:[%s2179_s10 + $0x10] sm:$0xff]  ;;  %1658 = vmatprep.subr.mxu0 %v1761_v3 }
 0x1a1   : > { %1624 = vmatpush3.msra.mxu1 %v884_v56  ;;  %1659 = vmatpush3.msra.mxu0 %v1160_v5 }
 0x1a2   : > { %v766_v16 = vsel %vm765_vm9, %v750_v14, %v764_v15  ;;  %1625 = vmatprep.subr.mxu1 %v1761_v3  ;;  %1660 = vmatprep.subr.mxu0 %v1761_v3  ;;  %v849_v14 = vld [vmem:[%s2197_s8 + $0x4] sm:$0x3] }
 0x1a3   : > { %v768_v17 = vsel %vm767_vm10, %v754_v12, %v766_v16  ;;  %1626 = vmatpush3.msra.mxu1 %v883_v63  ;;  %1661 = vmatpush3.msra.mxu0 %v1159_v6 }
 0x1a4   : > { %v770_v18 = vsel %vm712_vm11, %v768_v17, -1e+10  ;;  %1627 = vmatprep.subr.mxu1 %v1761_v3  ;;  %1676 = vmatprep.subr.mxu0 %v1761_v3 }
 0x1a5   : > { %v772_v19 = vsel %vm771_vm12, %v770_v18, -inf  ;;  %1628 = vmatpush3.msra.mxu1 %v882_v1  ;;  %v1558_v1 = vld [vmem:[%s2181_s12] ss:$0 sm:$0xff] }
 0x1a6   : > { %v773_v20 = vrot.slane %v772_v19, 4  ;;  %1643 = vmatprep.subr.mxu1 %v1761_v3 }
 0x1a8   : > { %v774_v21 = vmax.f32 %v772_v19, %v773_v20  ;;  %v851_v20 = vld [vmem:[%s2197_s8 + $0x8] sm:$0x3] }
 0x1aa   : > { %v775_v22 = vrot.slane %v774_v21, 2 }
 0x1ac   : > { %v776_v23 = vmax.f32 %v774_v21, %v775_v22  ;;  %v850_v21 = vld [vmem:[%s2197_s8 + $0x6] sm:$0x3] }
 0x1ae   : > { %v777_v24 = vrot.slane %v776_v23, 1 }
 0x1b0   : > { %v778_v25 = vmax.f32 %v776_v23, %v777_v24 }
 0x1b2   : > { %v779_v26 = vsub.f32 %v770_v18, %v778_v25 }
 0x1b4   : > { %v780_v27 = vmul.f32 1.442695, %v779_v26 }
 0x1b6   : > { %1728 = vpow2.f32 %v780_v27 }
 0x1c3   : > { %v1729_v28 = vpop.eup %1728 }
 0x1c4   : > { %v782_v29 = vsel %vm771_vm12, %v1729_v28, 0.0 }
 0x1c5   : > { %v783_v30 = vrot.slane %v782_v29, 4 }
 0x1c7   : > { %v784_v31 = vadd.f32 %v783_v30, %v782_v29  ;;  %v852_v30 = vld [vmem:[%s2197_s8 + $0xa] sm:$0x3] }
 0x1c9   : > { %v785_v32 = vrot.slane %v784_v31, 2 }
 0x1cb   : > { %v786_v33 = vadd.f32 %v785_v32, %v784_v31 }
 0x1cd   : > { %v787_v34 = vrot.slane %v786_v33, 1 }
 0x1cf   : > { %v788_v35 = vadd.f32 %v787_v34, %v786_v33 }
 0x1d1   : > { %1730 = vrcp.f32 %v788_v35 }
 0x1de   : > { %v1731_v39 = vpop.eup %1730 }
 0x1df   : > { %v790_v40 = vmul.f32 %v1731_v39, %v1729_v28  ;;  %v853_v28 = vld [vmem:[%s2197_s8 + $0xc] sm:$0x3] }
 0x1e1   : > { %v801_v41 = vrot.slane %v790_v40, %v800_v36  ;;  %v794_v42 = vrot.slane %v790_v40, %v793_v37  ;;  %v808_v47 = vrot.slane %v790_v40, %v807_v43  ;;  %v822_v48 = vrot.slane %v790_v40, %v821_v44 }
 0x1e2   : > { %v815_v58 = vrot.slane %v790_v40, %v814_v49  ;;  %v836_v59 = vrot.slane %v790_v40, %v835_v50  ;;  %v829_v2 = vrot.slane %v790_v40, %v828_v60  ;;  %v843_v53 = vrot.slane %v790_v40, %v842_v4  ;;  %v1041_v49 = vld [vmem:[%s2180_s11 + $0x8] sm:$0xff]  ;;  %v1040_v50 = vld [vmem:[%s2180_s11] sm:$0xff] }
 0x1e3   : > { %803 = vbcast.lane.b32.xlu1 %v801_v41, 256  ;;  %796 = vbcast.lane.b32.xlu0 %v794_v42, 256 }
 0x1e7   : > { %810 = vbcast.lane.b32.xlu1 %v808_v47, 256  ;;  %824 = vbcast.lane.b32.xlu0 %v822_v48, 256  ;;  %v1043_v47 = vld [vmem:[%s2180_s11 + $0x18] sm:$0xff]  ;;  %v1042_v48 = vld [vmem:[%s2180_s11 + $0x10] sm:$0xff] }
 0x1eb   : > { %817 = vbcast.lane.b32.xlu1 %v815_v58, 256  ;;  %838 = vbcast.lane.b32.xlu0 %v836_v59, 256  ;;  %v1559_v59 = vld [vmem:[%s2182_s13] ss:$0 sm:$0xff] }
 0x1ef   : > { %831 = vbcast.lane.b32.xlu1 %v829_v2, 256 }
 0x1f3   : > { %845 = vbcast.lane.b32.xlu1 %v843_v53, 256 }
 0x255   : > { %v804_v10 = vpop.permute.xlu1 %803  ;;  %v797_v11 = vpop.permute.xlu0 %796 }
 0x256   : > { %v856_v12 = vmul.f32 %v848_v8, %v804_v10  ;;  %v855_v13 = vmul.f32 %v847_v9, %v797_v11 }
 0x258   : > { %v864_v17 = vsel %vm686_vm3, %v856_v12, 0.0  ;;  %v863_v18 = vsel %vm686_vm3, %v855_v13, 0.0  ;;  %v1158_v13 = vld [vmem:[%s2183_s14 + $0x18] sm:$0xff] }
 0x259   : > { %v811_v15 = vpop.permute.xlu1 %810  ;;  %v825_v16 = vpop.permute.xlu0 %824  ;;  %v865_v23 = vadd.f32 %v864_v17, %v863_v18  ;;  %v1306_v17 = vld [vmem:[%s2185_s16 + $0x8] sm:$0xff]  ;;  %v1155_v18 = vld [vmem:[%s2183_s14] sm:$0xff] }
 0x25a   : > { %v857_v19 = vmul.f32 %v849_v14, %v811_v15  ;;  %v859_v25 = vmul.f32 %v851_v20, %v825_v16  ;;  %v1308_v14 = vld [vmem:[%s2185_s16 + $0x18] sm:$0xff]  ;;  %v1157_v15 = vld [vmem:[%s2183_s14 + $0x10] sm:$0xff]  ;;  %v1156_v16 = vld [vmem:[%s2183_s14 + $0x8] sm:$0xff] }
 0x25c   : > { %v866_v22 = vsel %vm686_vm3, %v857_v19, 0.0  ;;  %v870_v34 = vsel %vm686_vm3, %v859_v25, 0.0  ;;  %v1028_v51 = vpop.f32.mrf.mxu0  ;;  %v1305_v19 = vld [vmem:[%s2185_s16] sm:$0xff] }
 0x25d   : > { %v818_v24 = vpop.permute.xlu1 %817  ;;  %v867_v27 = vadd.f32 %v866_v22, %v865_v23  ;;  %v839_v29 = vpop.permute.xlu0 %838 }
 0x25e   : > { %v858_v26 = vmul.f32 %v850_v21, %v818_v24  ;;  %v861_v35 = vmul.f32 %v853_v28, %v839_v29  ;;  %v1642_v54 = vpop.f32.mrf.mxu0 }
 0x260   : > { %v868_v31 = vsel %vm686_vm3, %v858_v26, 0.0  ;;  %v874_v42 = vsel %vm686_vm3, %v861_v35, 0.0 }
 0x261   : > { %v869_v32 = vadd.f32 %v868_v31, %v867_v27  ;;  %v832_v33 = vpop.permute.xlu1 %831  ;;  %v1565_v31 = vld [vmem:[%s2186_s17] ss:$0 sm:$0xff] }
 0x262   : > { %v860_v36 = vmul.f32 %v852_v30, %v832_v33 }
 0x263   : > { %v871_v37 = vadd.f32 %v870_v34, %v869_v32 }
 0x264   : > { %v872_v39 = vsel %vm686_vm3, %v860_v36, 0.0 }
 0x265   : > { %v873_v40 = vadd.f32 %v872_v39, %v871_v37  ;;  %v846_v41 = vpop.permute.xlu1 %845 }
 0x266   : > { %v862_v43 = vmul.f32 %v854_v38, %v846_v41 }
 0x267   : > { %v875_v44 = vadd.f32 %v874_v42, %v873_v40  ;;  %v1418_v42 = vld [vmem:[%s2198_s29 + $0x18] sm:$0xff] }
 0x268   : > { %v876_v45 = vsel %vm686_vm3, %v862_v43, 0.0 }
 0x269   : > { %v877_v46 = vadd.f32 %v876_v45, %v875_v44 }
 0x26b   : > { %1630 = vmatmul.mubr.msk.f32.vlgmr.msra.gmra.mxu1 %vm573_vm2, %v877_v46  ;;  %1663 = vmatmul.mubr.msk.f32.vlgmr.msra.gmra.mxu0 %vm573_vm2, %v877_v46 }
 0x26c   : > { %1644 = vmatpush3.msra.mxu1 %v1043_v47  ;;  %1651 = vmatprep.mubr.msk.f32.mxu1 %vm1762_vm1, %v1761_v3  ;;  %v1417_v47 = vld [vmem:[%s2198_s29 + $0x10] sm:$0xff] }
 0x26d   : > { %1645 = vmatprep.subr.mxu1 %v1761_v3  ;;  %1684 = vmatprep.mubr.msk.f32.mxu0 %vm1762_vm1, %v1761_v3 }
 0x26e   : > { %1646 = vmatpush3.msra.mxu1 %v1042_v48  ;;  %1677 = vmatpush3.msra.mxu0 %v1308_v14  ;;  %v1416_v48 = vld [vmem:[%s2198_s29 + $0x8] sm:$0xff] }
 0x26f   : > { %1647 = vmatprep.subr.mxu1 %v1761_v3  ;;  %1678 = vmatprep.subr.mxu0 %v1761_v3 }
 0x270   : > { %1648 = vmatpush3.msra.mxu1 %v1041_v49  ;;  %v1415_v49 = vld [vmem:[%s2198_s29] sm:$0xff] }
 0x271   : > { %1649 = vmatprep.subr.mxu1 %v1761_v3 }
 0x272   : > { %1650 = vmatpush3.msra.mxu1 %v1040_v50 }
 0x273   : > { %1652 = vmatmul.mubr.msk.f32.vlgmr.msra.gmra.mxu1 %vm573_vm2, %v1912_v7  ;;  %1665 = vmatprep.subr.mxu1 %v1761_v3 }
 0x274   : > { %1673 = vmatprep.mubr.msk.f32.mxu1 %vm1762_vm1, %v1761_v3  ;;  %1666 = vmatpush3.msra.mxu1 %v1158_v13 }
 0x275   : > { %1667 = vmatprep.subr.mxu1 %v1761_v3 }
 0x276   : > { %1668 = vmatpush3.msra.mxu1 %v1157_v15 }
 0x277   : > { %1669 = vmatprep.subr.mxu1 %v1761_v3 }
 0x278   : > { %1670 = vmatpush3.msra.mxu1 %v1156_v16 }
 0x279   : > { %1671 = vmatprep.subr.mxu1 %v1761_v3 }
 0x27a   : > { %1672 = vmatpush3.msra.mxu1 %v1155_v18 }
 0x27b   : > { %1687 = vmatprep.subr.mxu1 %v1761_v3 }
 0x32b   : > { %v955_v55 = vpop.f32.mrf.mxu1  ;;  %v2094_v56 = vpop.f32.mrf.mxu0 }
 0x32c   : > { %v1029_v0 = vadd.f32 %v1028_v51, %v955_v55 }
 0x32d   : > { %v1631_v57 = vpop.f32.mrf.mxu1  ;;  %v1664_v58 = vpop.f32.mrf.mxu0 }
 0x32e   : > { %v1039_v2 = vadd.f32 %v1558_v1, %v1029_v0 }
 0x333   : > { %v1117_v60 = vpop.f32.mrf.mxu1 }
 0x334   : > { %v1118_v62 = vadd.f32 %v1559_v59, %v1117_v60 }
 0x335   : > { %v1653_v63 = vpop.f32.mrf.mxu1 }
 0x336   : > { %1129 = vrot.lane.b32.xlu0 %v1118_v62, %s1763_s30  ;;  %v1121_v4 = vadd.f32 %v1118_v62, %v1039_v2 }
 0x338   : > { %v1561_v5 = vmul.f32 -1.442695, %v1121_v4 }
 0x33a   : > { %1732 = vpow2.f32 %v1561_v5 }
 0x347   : > { %v1733_v6 = vpop.eup %1732 }
 0x348   : > { %v1125_v53 = vadd.f32 1.0, %v1733_v6 }
 0x34a   : > { %1734 = vrcp.f32 %v1125_v53 }
 0x357   : > { %v1735_v8 = vpop.eup %1734 }
 0x358   : > { %v1139_v22 = vsub.f32 1.0, %v1735_v8 }
 0x3a8   : > { %v1130_v9 = vpop.permute.xlu0 %1129 }
 0x3a9   : > { %v1132_v10 = vmul.f32 %v1735_v8, %v1130_v9 }
 0x3ab   : > { %1134 = vrot.lane.b32.xlu1 %v1132_v10, %s1763_s30 }
 0x3af   : > { %1145 = vrot.lane.b32.xlu1 %v1912_v7, %s1764_s21  ;;  %v1307_v7 = vld [vmem:[%s2185_s16 + $0x10] sm:$0xff] }
 0x3b0   : > { %1679 = vmatpush3.msra.mxu0 %v1307_v7 }
 0x3b1   : > { %1680 = vmatprep.subr.mxu0 %v1761_v3 }
 0x3b2   : > { %1681 = vmatpush3.msra.mxu0 %v1306_v17 }
 0x3b3   : > { %1682 = vmatprep.subr.mxu0 %v1761_v3 }
 0x3b4   : > { %1683 = vmatpush3.msra.mxu0 %v1305_v19 }
 0x3b5   : > { %1685 = vmatmul.mubr.msk.f32.vlgmr.msra.gmra.mxu0 %vm573_vm2, %v2004_v61 }
 0x41d   : > { %v1135_v11 = vpop.permute.xlu1 %1134 }
 0x41e   : > { %v1137_v12 = vadd.f32 %v1135_v11, %v1039_v2 }
 0x420   : > { %1736 = vtanh.f32 %v1137_v12 }
 0x421   : > { %v1146_v21 = vpop.permute.xlu1 %1145 }
 0x422   : > { %v1148_v24 = vmul.f32 %v1735_v8, %v1146_v21 }
 0x42d   : > { %v1737_v20 = vpop.eup %1736 }
 0x42e   : > { %1141 = vrot.lane.b32.xlu0 %v1737_v20, %s1765_s24 }
 0x475   : > { %v1375_v61 = vpop.f32.mrf.mxu0 }
 0x477   : > { %v1686_v28 = vpop.f32.mrf.mxu0 }
 0x4a0   : > { %v1142_v23 = vpop.permute.xlu0 %1141 }
 0x4a1   : > { %v1144_v25 = vmul.f32 %v1142_v23, %v1139_v22 }
 0x4a3   : > { %v1149_v26 = vadd.f32 %v1148_v24, %v1144_v25 }
 0x4a5   : > { %1151 = vrot.lane.b32.xlu0 %v1149_v26, %s1765_s24 }
 0x517   : > { %v1152_v27 = vpop.permute.xlu0 %1151 }
 0x518   : > { %1154 = vst.msk [vmem:[#allocation2] sm:$0x3] %vm686_vm3, %v1152_v27  ;;  %1674 = vmatmul.mubr.msk.f32.vlgmr.msra.gmra.mxu1 %vm573_vm2, %v1152_v27 }
 0x519   : > { %1695 = vmatprep.mubr.msk.f32.mxu1 %vm1762_vm1, %v1761_v3  ;;  %1688 = vmatpush3.msra.mxu1 %v1418_v42 }
 0x51a   : > { %1689 = vmatprep.subr.mxu1 %v1761_v3 }
 0x51b   : > { %1690 = vmatpush3.msra.mxu1 %v1417_v47 }
 0x51c   : > { %1691 = vmatprep.subr.mxu1 %v1761_v3 }
 0x51d   : > { %1692 = vmatpush3.msra.mxu1 %v1416_v48 }
 0x51e   : > { %1693 = vmatprep.subr.mxu1 %v1761_v3 }
 0x51f   : > { %1694 = vmatpush3.msra.mxu1 %v1415_v49 }
 0x5d8   : > { %v1301_v29 = vpop.f32.mrf.mxu1 }
 0x5d9   : > { %v1302_v30 = vadd.f32 %v1301_v29, %v2094_v56 }
 0x5da   : > { %v1675_v32 = vpop.f32.mrf.mxu1 }
 0x5db   : > { %v1379_v33 = vadd.f32 %v1375_v61, %v1302_v30 }
 0x5dd   : > { %v1387_v34 = vadd.f32 %v1565_v31, %v1379_v33 }
 0x5df   : > { %1388 = vst [vmem:[%s1883_s26] sm:$0x3] %v1387_v34  ;;  %v1390_v35 = vsel %vm1389_vm14, %v1387_v34, -1e+30 }
 0x5e0   : > { %v1392_v36 = vsel %vm1391_vm15, %v1390_v35, -inf }
 0x5e1   : > { %1393 = vmax.xlane.f32.xlu1 %v1392_v36 }
 0x66a   : > { %v1394_v37 = vpop.xlane.xlu1 %1393 }
 0x66b   : > { %vm1395_vm0 = vcmp.eq.f32.partialorder %v1390_v35, %v1394_v37 }
 0x66c   : > { %v1396_v38 = vsel %vm1395_vm0, %v1955_v52, 128 }
 0x66d   : > { %v1397_v39 = vsel %vm1391_vm15, %v1396_v38, 2147483647 }
 0x66e   : > { %v1399_v40 = vshra.s32 %v1397_v39, 16  ;;  %v1398_v43 = vand.u32 65535, %v1397_v39 }
 0x670   : > { %v1401_v41 = vcvt.s32.f32 %v1399_v40  ;;  %v1400_v45 = vcvt.s32.f32 %v1398_v43 }
 0x672   : > { %1402 = vmin.xlane.f32.xlu0 %v1401_v41 }
 0x6fb   : > { %v1403_v44 = vpop.xlane.xlu0 %1402 }
 0x6fc   : > { %vm1404_vm1 = vcmp.eq.f32.partialorder %v1401_v41, %v1403_v44  ;;  %v1409_v50 = vcvt.f32.s32 %v1403_v44 }
 0x6fd   : > { %v1405_v46 = vsel %vm1404_vm1, %v1400_v45, inf }
 0x6fe   : > { %1406 = vmin.xlane.f32.xlu0 %v1405_v46  ;;  %v1410_v54 = vshll.u32 %v1409_v50, 16 }
 0x787   : > { %v1407_v51 = vpop.xlane.xlu0 %1406 }
 0x788   : > { %v1408_v55 = vcvt.f32.s32 %v1407_v51 }
 0x78a   : > { %v1411_v56 = vadd.s32 %v1410_v54, %v1408_v55 }
 0x78c   : > { %vm1412_vm4 = vcmp.eq.s32.totalorder %v1955_v52, %v1411_v56 }
 0x78d   : > { %v1566_v57 = vsel %vm1412_vm4, 1.0, %v1761_v3 }
 0x78e   : > { %1696 = vmatmul.mubr.msk.f32.vlgmr.msra.gmra.mxu1 %vm573_vm2, %v1566_v57 }
 0x84e   : > { %v1488_v58 = vpop.f32.mrf.mxu1 }
 0x84f   : > { %1492 = vst.msk [vmem:[#allocation3] sm:$0x3] %vm686_vm3, %v1488_v58 }
 0x850   : > { %v1697_v59 = vpop.f32.mrf.mxu1 }
 0x851 PF: > { %s34_s19 = sadd.s32 1, %s1758_s19  }
 0x852   : > { %p31_p13 = scmp.ge.s32.totalorder %s34_s19, 9  }
 0x854   :  { %33 = sbr.rel (!%p31_p13) target bundleno = 26 (0x1a), region = 122 }

</bundles_post_ra>
